<compile_context>
chip_gen: v7x
topology: tpu7x:2x2x1
jax: 0.10.0
libtpu: 0.0.40
codegen_flags: <defaults>
</compile_context>

<pallas_src>
import jax
import jax.numpy as jnp
from jax import lax
from jax.experimental import pallas as pl
from jax.experimental.pallas import tpu as pltpu


def _round_up(x, m):
    return (x + m - 1) // m * m


def _conv3x3_taps(a, w_all, cp):
    """3x3 'same' convolution as 9 shifted-operand MXU matmuls.

    a     : (Bt, R+2, W2, C) bf16 value.  Row j corresponds to source row
            (out_row_start - 1 + j); one halo row above/below is already
            included (and already zeroed where it falls outside the image).
    w_all : (9, C, cp) bf16 value, tap-major k = 3*dy + dx.
    Returns the f32 accumulator of shape (Bt*R*W2, cp).
    """
    Bt, Rp2, W2, C = a.shape
    R = Rp2 - 2
    M = Bt * R * W2
    acc = jnp.zeros((M, cp), jnp.float32)
    zcol = jnp.zeros((Bt, Rp2, 1, C), a.dtype)
    for dx in (-1, 0, 1):
        if dx == 0:
            ax = a
        elif dx == -1:        # operand[x] = src[x - 1]; column 0 is zero padding
            ax = jnp.concatenate([zcol, a[:, :, :W2 - 1, :]], axis=2)
        else:                 # operand[x] = src[x + 1]; column W2-1 is zero padding
            ax = jnp.concatenate([a[:, :, 1:, :], zcol], axis=2)
        for dy in (-1, 0, 1):
            w_tap = w_all[3 * (dy + 1) + (dx + 1)]          # (C, cp)
            rows = ax[:, 1 + dy:1 + dy + R, :, :].reshape(M, C)
            acc = acc + jnp.dot(rows, w_tap,
                                preferred_element_type=jnp.float32)
    return acc


def unet_down_kernel(xc_ref, xt_ref, xb_ref, w1_ref, s1_ref, b1_ref,
                     w2_ref, s2_ref, b2_ref, o_ref):
    Bt, Sh, W2, Cp = o_ref.shape
    Cin = xc_ref.shape[-1] // 2
    s = pl.program_id(1)
    ns = pl.num_programs(1)

    def pool2x2(x):           # (Bt, r, 2, W2, 2*Cin) -> (Bt, r, W2, Cin)
        rows = jnp.maximum(x[:, :, 0, :, :], x[:, :, 1, :, :])
        return jnp.maximum(rows[..., :Cin], rows[..., Cin:])

    # ---- MaxPool2d(2) of the strip and of the two 2-row halo blocks. ----
    # Halo blocks whose rows fall outside the image (clamped index maps) are
    # zeroed here, which is exactly conv #1's zero padding in H.
    p_c = pool2x2(xc_ref[...])                                    # (Bt,Sh,W2,Cin)
    p_t = pool2x2(xt_ref[...]) * (s > 0).astype(jnp.bfloat16)     # (Bt,2,W2,Cin)
    p_b = pool2x2(xb_ref[...]) * (s < ns - 1).astype(jnp.bfloat16)
    p_ext = jnp.concatenate([p_t, p_c, p_b], axis=1)              # (Bt,Sh+4,W2,Cin)

    # ---- Conv3x3 #1 (+ folded BN + ReLU) over Sh+2 rows: the strip plus a
    # 1-row halo of h needed by conv #2.  Strip-sized f32 accumulator only. ----
    acc1 = _conv3x3_taps(p_ext, w1_ref[...], Cp)                  # (Bt*(Sh+2)*W2, Cp)
    h = jnp.maximum(acc1 * s1_ref[...] + b1_ref[...], 0.0)
    h = h.astype(jnp.bfloat16).reshape(Bt, Sh + 2, W2, Cp)

    # Conv #2's zero padding applies to h itself: zero the halo rows of h that
    # lie outside the image (top row of the first strip, bottom row of the last).
    topk = jnp.broadcast_to((s > 0).astype(h.dtype), (1, 1, W2, 1))
    botk = jnp.broadcast_to((s < ns - 1).astype(h.dtype), (1, 1, W2, 1))
    midk = jnp.ones((1, Sh, W2, 1), h.dtype)
    h = h * jnp.concatenate([topk, midk, botk], axis=1)

    # ---- Conv3x3 #2 (+ folded BN + ReLU); Cp is a multiple of 128 so the
    # intermediate h, the matmuls and the output store are all lane-dense. ----
    acc2 = _conv3x3_taps(h, w2_ref[...], Cp)                      # (Bt*Sh*W2, Cp)
    out = jnp.maximum(acc2 * s2_ref[...] + b2_ref[...], 0.0)
    o_ref[...] = out.reshape(Bt, Sh, W2, Cp).astype(o_ref.dtype)


def _pick_strip_h(h2):
    """Largest even divisor of h2 that is <= min(16, h2 // 2); falls back to a
    single full-height strip when no even divisor exists."""
    limit = max(2, min(16, h2 // 2))
    best = None
    for cand in range(2, limit + 1, 2):
        if h2 % cand == 0:
            best = cand
    return best if best is not None else h2


def unet_downsampling_block(x_nchw, w1_hwio, s1, b1, w2_hwio, s2, b2,
                            strip_h=None, out_dtype=jnp.bfloat16):
    """x_nchw: (N, Cin, H, W) float32.  Returns (N, Cout, H//2, W//2) out_dtype."""
    N, Cin, H, W = x_nchw.shape
    Cout = w1_hwio.shape[-1]
    assert H % 2 == 0 and W % 2 == 0, "MaxPool2d(2) requires even H, W"
    H2, W2 = H // 2, W // 2
    if strip_h is None:
        strip_h = _pick_strip_h(H2)
    assert H2 % strip_h == 0
    num_strips = H2 // strip_h
    hb = strip_h // 2                       # halo index stride (2 pooled rows / block)
    nhalo_blocks = max(H2 // 2, 1)

    Cp = _round_up(Cout, 128)               # lane-dense h / output / weights

    # Layout glue (single fused XLA pass): NCHW -> NHWC, cast to bf16, and
    # reinterpret (free reshape) as (N, H2, 2, W2, 2*Cin) so the 2x2 pool taps
    # are plain slices inside the kernel.
    # TODO(synk): keep NHWC (or this pooled layout) end-to-end between UNet
    # blocks so this transpose and the final one disappear from the hot path.
    x = jnp.transpose(x_nchw, (0, 2, 3, 1)).astype(jnp.bfloat16)
    x = x.reshape(N, H2, 2, W2, 2 * Cin)

    # Weights: HWIO -> (9, C, Cp) tap-major, zero-padded to 128-aligned Cout.
    # The BN scale/shift are zero-padded too so padded h channels stay exactly 0.
    w1m = jnp.pad(w1_hwio.reshape(9, Cin, Cout).astype(jnp.bfloat16),
                  ((0, 0), (0, 0), (0, Cp - Cout)))
    w2m = jnp.pad(w2_hwio.reshape(9, Cout, Cout).astype(jnp.bfloat16),
                  ((0, 0), (0, Cp - Cout), (0, Cp - Cout)))
    s1p = jnp.pad(s1.reshape(1, Cout).astype(jnp.float32), ((0, 0), (0, Cp - Cout)))
    b1p = jnp.pad(b1.reshape(1, Cout).astype(jnp.float32), ((0, 0), (0, Cp - Cout)))
    s2p = jnp.pad(s2.reshape(1, Cout).astype(jnp.float32), ((0, 0), (0, Cp - Cout)))
    b2p = jnp.pad(b2.reshape(1, Cout).astype(jnp.float32), ((0, 0), (0, Cp - Cout)))

    # VMEM budget: strip-sized I/O blocks (double-buffered) + weights + live
    # strip-sized values, clamped to <= ~85% of the physical per-core VMEM.
    out_isize = jnp.dtype(out_dtype).itemsize
    bytes_io = 2 * (strip_h * 2 * W2 * 2 * Cin * 2            # center input block
                    + 2 * (2 * 2 * W2 * 2 * Cin * 2)          # two halo blocks
                    + strip_h * W2 * Cp * out_isize)          # output block
    bytes_w = 9 * (Cin + Cp) * Cp * 2 + 4 * Cp * 4
    bytes_live = ((strip_h + 4) * W2 * Cin * 2 * 4            # p_ext + shifted copies
                  + (strip_h + 2) * W2 * (Cin * 2 + Cp * 4 + 3 * Cp * 2)
                  + strip_h * W2 * Cp * (4 + out_isize))      # acc2 + out
    est = 2 * (bytes_io + bytes_w) + 2 * bytes_live
    try:
        cap = int(getattr(pltpu.get_tpu_info(), "vmem_capacity_bytes",
                          64 * 1024 * 1024))
    except Exception:                       # CPU tracing / older runtimes
        cap = 64 * 1024 * 1024
    vmem_limit = int(min(int(cap * 0.85), max(32 * 1024 * 1024, est)))

    out_nhwc = pl.pallas_call(
        unet_down_kernel,
        out_shape=jax.ShapeDtypeStruct((N, H2, W2, Cp), out_dtype),
        grid=(N, num_strips),
        in_specs=[
            # strip of the input (pooled rows [s*strip_h, (s+1)*strip_h))
            pl.BlockSpec((1, strip_h, 2, W2, 2 * Cin),
                         lambda b, s: (b, s, 0, 0, 0)),
            # 2 pooled rows just above the strip (clamped at the top border)
            pl.BlockSpec((1, 2, 2, W2, 2 * Cin),
                         lambda b, s: (b, jnp.maximum(s * hb - 1, 0), 0, 0, 0)),
            # 2 pooled rows just below the strip (clamped at the bottom border)
            pl.BlockSpec((1, 2, 2, W2, 2 * Cin),
                         lambda b, s: (b, jnp.minimum((s + 1) * hb,
                                                      nhalo_blocks - 1), 0, 0, 0)),
            pl.BlockSpec((9, Cin, Cp), lambda b, s: (0, 0, 0)),
            pl.BlockSpec((1, Cp), lambda b, s: (0, 0)),
            pl.BlockSpec((1, Cp), lambda b, s: (0, 0)),
            pl.BlockSpec((9, Cp, Cp), lambda b, s: (0, 0, 0)),
            pl.BlockSpec((1, Cp), lambda b, s: (0, 0)),
            pl.BlockSpec((1, Cp), lambda b, s: (0, 0)),
        ],
        out_specs=pl.BlockSpec((1, strip_h, W2, Cp), lambda b, s: (b, s, 0, 0)),
        compiler_params=pltpu.CompilerParams(
            dimension_semantics=("parallel", "parallel"),
            vmem_limit_bytes=vmem_limit),
    )(x, x, x, w1m, s1p, b1p, w2m, s2p, b2p)

    # TODO(synk): drop the channel un-pad + NHWC->NCHW transpose when the
    # consumer is another NHWC Pallas block; kept to match the PyTorch module.
    return jnp.transpose(out_nhwc[..., :Cout], (0, 3, 1, 2))


def reference(x_nchw, w1_hwio, s1, b1, w2_hwio, s2, b2,
              match_kernel_precision=True):
    """Pure-JAX reference of the same forward pass.  With
    match_kernel_precision, conv operands are rounded through bf16 (with f32
    accumulation), mirroring the kernel's MXU precision policy."""
    q = (lambda a: a.astype(jnp.bfloat16).astype(jnp.float32)) \
        if match_kernel_precision else (lambda a: a)
    x = q(jnp.transpose(x_nchw, (0, 2, 3, 1)))
    p = lax.reduce_window(x, -jnp.inf, lax.max,
                          (1, 2, 2, 1), (1, 2, 2, 1), "VALID")
    dn = ("NHWC", "HWIO", "NHWC")
    h = lax.conv_general_dilated(p, q(w1_hwio), (1, 1), "SAME",
                                 dimension_numbers=dn,
                                 preferred_element_type=jnp.float32)
    h = jnp.maximum(h * s1.reshape(1, 1, 1, -1) + b1.reshape(1, 1, 1, -1), 0.0)
    o = lax.conv_general_dilated(q(h), q(w2_hwio), (1, 1), "SAME",
                                 dimension_numbers=dn,
                                 preferred_element_type=jnp.float32)
    o = jnp.maximum(o * s2.reshape(1, 1, 1, -1) + b2.reshape(1, 1, 1, -1), 0.0)
    return jnp.transpose(o, (0, 3, 1, 2))


def fold_bn(gamma, beta, mean, var, eps=1e-5):
    scale = gamma / jnp.sqrt(var + eps)
    shift = beta - mean * scale
    return scale, shift


if __name__ == "__main__":
    N, Cin, Cout, H, W = 2, 4, 8, 16, 16

    key = jax.random.PRNGKey(0)
    keys = jax.random.split(key, 11)

    x = jax.random.normal(keys[0], (N, Cin, H, W), jnp.float32)

    # Conv weights in PyTorch layout (Cout, Cin, 3, 3) -> HWIO (3, 3, Cin, Cout)
    w1_t = jax.random.normal(keys[1], (Cout, Cin, 3, 3), jnp.float32) * 0.2
    w2_t = jax.random.normal(keys[2], (Cout, Cout, 3, 3), jnp.float32) * 0.2
    w1 = jnp.transpose(w1_t, (2, 3, 1, 0))
    w2 = jnp.transpose(w2_t, (2, 3, 1, 0))

    # BatchNorm2d (eval mode) parameters, folded into per-channel scale/shift.
    g1 = 1.0 + 0.1 * jax.random.normal(keys[3], (Cout,), jnp.float32)
    bt1 = 0.1 * jax.random.normal(keys[4], (Cout,), jnp.float32)
    m1 = 0.1 * jax.random.normal(keys[5], (Cout,), jnp.float32)
    v1 = 1.0 + 0.1 * jax.random.uniform(keys[6], (Cout,), jnp.float32)
    g2 = 1.0 + 0.1 * jax.random.normal(keys[7], (Cout,), jnp.float32)
    bt2 = 0.1 * jax.random.normal(keys[8], (Cout,), jnp.float32)
    m2 = 0.1 * jax.random.normal(keys[9], (Cout,), jnp.float32)
    v2 = 1.0 + 0.1 * jax.random.uniform(keys[10], (Cout,), jnp.float32)

    s1, b1 = fold_bn(g1, bt1, m1, v1)
    s2, b2 = fold_bn(g2, bt2, m2, v2)

    out = jax.jit(unet_downsampling_block)(x, w1, s1, b1, w2, s2, b2)
    out = jax.block_until_ready(out)
    assert out.shape == (N, Cout, H // 2, W // 2)

    # Compare against a precision-matched reference (bf16 conv operands, f32
    # accumulation; the kernel additionally writes its output in bf16).
    ref = reference(x, w1, s1, b1, w2, s2, b2, match_kernel_precision=True)
    out_f32 = out.astype(jnp.float32)
    max_err = float(jnp.max(jnp.abs(out_f32 - ref)))
    assert jnp.allclose(out_f32, ref, rtol=2e-2, atol=2e-2), max_err

    print("KERNEL_OK")
</pallas_src>

<mosaic_0001>
module attributes {stable_mosaic.version = 11 : i64} {
  func.func @unet_down_kernel(%arg0: i32, %arg1: i32, %arg2: memref<1x4x2x8x8xbf16, #tpu.memory_space<vmem>>, %arg3: memref<1x2x2x8x8xbf16, #tpu.memory_space<vmem>>, %arg4: memref<1x2x2x8x8xbf16, #tpu.memory_space<vmem>>, %arg5: memref<9x4x128xbf16, #tpu.memory_space<vmem>>, %arg6: memref<1x128xf32, #tpu.memory_space<vmem>>, %arg7: memref<1x128xf32, #tpu.memory_space<vmem>>, %arg8: memref<9x128x128xbf16, #tpu.memory_space<vmem>>, %arg9: memref<1x128xf32, #tpu.memory_space<vmem>>, %arg10: memref<1x128xf32, #tpu.memory_space<vmem>>, %arg11: memref<1x4x8x128xbf16, #tpu.memory_space<vmem>>) attributes {dimension_semantics = [#tpu.dimension_semantics<parallel>, #tpu.dimension_semantics<parallel>], iteration_bounds = array<i64: 2, 2>, scalar_prefetch = 0 : i64, scratch_operands = 0 : i64, tpu.core_type = #tpu.core_type<tc>, window_params = [{transform_indices = @transform_0, window_bounds = array<i64: 1, 4, 2, 8, 8>}, {transform_indices = @transform_1, window_bounds = array<i64: 1, 2, 2, 8, 8>}, {transform_indices = @transform_2, window_bounds = array<i64: 1, 2, 2, 8, 8>}, {pipeline_mode = #tpu.pipeline_mode<synchronous>, transform_indices = @transform_3, window_bounds = array<i64: 9, 4, 128>}, {pipeline_mode = #tpu.pipeline_mode<synchronous>, transform_indices = @transform_4, window_bounds = array<i64: 1, 128>}, {pipeline_mode = #tpu.pipeline_mode<synchronous>, transform_indices = @transform_5, window_bounds = array<i64: 1, 128>}, {pipeline_mode = #tpu.pipeline_mode<synchronous>, transform_indices = @transform_6, window_bounds = array<i64: 9, 128, 128>}, {pipeline_mode = #tpu.pipeline_mode<synchronous>, transform_indices = @transform_7, window_bounds = array<i64: 1, 128>}, {pipeline_mode = #tpu.pipeline_mode<synchronous>, transform_indices = @transform_8, window_bounds = array<i64: 1, 128>}, {transform_indices = @transform_9, window_bounds = array<i64: 1, 4, 8, 128>}]} {
    %c0 = arith.constant 0 : index
    %c0_0 = arith.constant 0 : index
    %c0_1 = arith.constant 0 : index
    %c0_2 = arith.constant 0 : index
    %c0_3 = arith.constant 0 : index
    %0 = vector.load %arg2[%c0, %c0_0, %c0_1, %c0_2, %c0_3] : memref<1x4x2x8x8xbf16, #tpu.memory_space<vmem>>, vector<1x4x2x8x8xbf16>
    %1 = vector.extract_strided_slice %0 {offsets = [0, 0, 0, 0, 0], sizes = [1, 4, 1, 8, 8], strides = [1, 1, 1, 1, 1]} : vector<1x4x2x8x8xbf16> to vector<1x4x1x8x8xbf16>
    %2 = vector.shape_cast %1 : vector<1x4x1x8x8xbf16> to vector<1x4x8x8xbf16>
    %3 = vector.extract_strided_slice %0 {offsets = [0, 0, 1, 0, 0], sizes = [1, 4, 1, 8, 8], strides = [1, 1, 1, 1, 1]} : vector<1x4x2x8x8xbf16> to vector<1x4x1x8x8xbf16>
    %4 = vector.shape_cast %3 : vector<1x4x1x8x8xbf16> to vector<1x4x8x8xbf16>
    %5 = arith.maximumf %2, %4 : vector<1x4x8x8xbf16>
    %6 = vector.extract_strided_slice %5 {offsets = [0, 0, 0, 0], sizes = [1, 4, 8, 4], strides = [1, 1, 1, 1]} : vector<1x4x8x8xbf16> to vector<1x4x8x4xbf16>
    %7 = vector.extract_strided_slice %5 {offsets = [0, 0, 0, 4], sizes = [1, 4, 8, 4], strides = [1, 1, 1, 1]} : vector<1x4x8x8xbf16> to vector<1x4x8x4xbf16>
    %8 = arith.maximumf %6, %7 : vector<1x4x8x4xbf16>
    %c0_4 = arith.constant 0 : index
    %c0_5 = arith.constant 0 : index
    %c0_6 = arith.constant 0 : index
    %c0_7 = arith.constant 0 : index
    %c0_8 = arith.constant 0 : index
    %9 = vector.load %arg3[%c0_4, %c0_5, %c0_6, %c0_7, %c0_8] : memref<1x2x2x8x8xbf16, #tpu.memory_space<vmem>>, vector<1x2x2x8x8xbf16>
    %10 = vector.extract_strided_slice %9 {offsets = [0, 0, 0, 0, 0], sizes = [1, 2, 1, 8, 8], strides = [1, 1, 1, 1, 1]} : vector<1x2x2x8x8xbf16> to vector<1x2x1x8x8xbf16>
    %11 = vector.shape_cast %10 : vector<1x2x1x8x8xbf16> to vector<1x2x8x8xbf16>
    %12 = vector.extract_strided_slice %9 {offsets = [0, 0, 1, 0, 0], sizes = [1, 2, 1, 8, 8], strides = [1, 1, 1, 1, 1]} : vector<1x2x2x8x8xbf16> to vector<1x2x1x8x8xbf16>
    %13 = vector.shape_cast %12 : vector<1x2x1x8x8xbf16> to vector<1x2x8x8xbf16>
    %14 = arith.maximumf %11, %13 : vector<1x2x8x8xbf16>
    %15 = vector.extract_strided_slice %14 {offsets = [0, 0, 0, 0], sizes = [1, 2, 8, 4], strides = [1, 1, 1, 1]} : vector<1x2x8x8xbf16> to vector<1x2x8x4xbf16>
    %16 = vector.extract_strided_slice %14 {offsets = [0, 0, 0, 4], sizes = [1, 2, 8, 4], strides = [1, 1, 1, 1]} : vector<1x2x8x8xbf16> to vector<1x2x8x4xbf16>
    %17 = arith.maximumf %15, %16 : vector<1x2x8x4xbf16>
    %c0_i32 = arith.constant 0 : i32
    %18 = arith.cmpi sgt, %arg1, %c0_i32 : i32
    %19 = arith.extui %18 : i1 to i32
    %20 = arith.sitofp %19 : i32 to f32
    %21 = arith.truncf %20 : f32 to bf16
    %22 = vector.broadcast %21 : bf16 to vector<1x2x8x4xbf16>
    %23 = arith.mulf %17, %22 : vector<1x2x8x4xbf16>
    %c0_9 = arith.constant 0 : index
    %c0_10 = arith.constant 0 : index
    %c0_11 = arith.constant 0 : index
    %c0_12 = arith.constant 0 : index
    %c0_13 = arith.constant 0 : index
    %24 = vector.load %arg4[%c0_9, %c0_10, %c0_11, %c0_12, %c0_13] : memref<1x2x2x8x8xbf16, #tpu.memory_space<vmem>>, vector<1x2x2x8x8xbf16>
    %25 = vector.extract_strided_slice %24 {offsets = [0, 0, 0, 0, 0], sizes = [1, 2, 1, 8, 8], strides = [1, 1, 1, 1, 1]} : vector<1x2x2x8x8xbf16> to vector<1x2x1x8x8xbf16>
    %26 = vector.shape_cast %25 : vector<1x2x1x8x8xbf16> to vector<1x2x8x8xbf16>
    %27 = vector.extract_strided_slice %24 {offsets = [0, 0, 1, 0, 0], sizes = [1, 2, 1, 8, 8], strides = [1, 1, 1, 1, 1]} : vector<1x2x2x8x8xbf16> to vector<1x2x1x8x8xbf16>
    %28 = vector.shape_cast %27 : vector<1x2x1x8x8xbf16> to vector<1x2x8x8xbf16>
    %29 = arith.maximumf %26, %28 : vector<1x2x8x8xbf16>
    %30 = vector.extract_strided_slice %29 {offsets = [0, 0, 0, 0], sizes = [1, 2, 8, 4], strides = [1, 1, 1, 1]} : vector<1x2x8x8xbf16> to vector<1x2x8x4xbf16>
    %31 = vector.extract_strided_slice %29 {offsets = [0, 0, 0, 4], sizes = [1, 2, 8, 4], strides = [1, 1, 1, 1]} : vector<1x2x8x8xbf16> to vector<1x2x8x4xbf16>
    %32 = arith.maximumf %30, %31 : vector<1x2x8x4xbf16>
    %c1_i32 = arith.constant 1 : i32
    %33 = arith.cmpi slt, %arg1, %c1_i32 : i32
    %34 = arith.extui %33 : i1 to i32
    %35 = arith.sitofp %34 : i32 to f32
    %36 = arith.truncf %35 : f32 to bf16
    %37 = vector.broadcast %36 : bf16 to vector<1x2x8x4xbf16>
    %38 = arith.mulf %32, %37 : vector<1x2x8x4xbf16>
    %39 = tpu.concatenate %23, %8, %38 in 1 : vector<1x2x8x4xbf16>, vector<1x4x8x4xbf16>, vector<1x2x8x4xbf16> -> vector<1x8x8x4xbf16>
    %c0_14 = arith.constant 0 : index
    %c0_15 = arith.constant 0 : index
    %c0_16 = arith.constant 0 : index
    %40 = vector.load %arg5[%c0_14, %c0_15, %c0_16] : memref<9x4x128xbf16, #tpu.memory_space<vmem>>, vector<9x4x128xbf16>
    %cst = arith.constant 0.000000e+00 : f32
    %41 = vector.broadcast %cst : f32 to vector<48x128xf32>
    %cst_17 = arith.constant 0.000000e+00 : bf16
    %42 = vector.broadcast %cst_17 : bf16 to vector<1x8x1x4xbf16>
    %43 = vector.extract_strided_slice %39 {offsets = [0, 0, 0, 0], sizes = [1, 8, 7, 4], strides = [1, 1, 1, 1]} : vector<1x8x8x4xbf16> to vector<1x8x7x4xbf16>
    %44 = tpu.concatenate %42, %43 in 2 : vector<1x8x1x4xbf16>, vector<1x8x7x4xbf16> -> vector<1x8x8x4xbf16>
    %45 = vector.extract_strided_slice %40 {offsets = [0, 0, 0], sizes = [1, 4, 128], strides = [1, 1, 1]} : vector<9x4x128xbf16> to vector<1x4x128xbf16>
    %46 = vector.shape_cast %45 : vector<1x4x128xbf16> to vector<4x128xbf16>
    %47 = vector.extract_strided_slice %44 {offsets = [0, 0, 0, 0], sizes = [1, 6, 8, 4], strides = [1, 1, 1, 1]} : vector<1x8x8x4xbf16> to vector<1x6x8x4xbf16>
    %48 = vector.shape_cast %47 : vector<1x6x8x4xbf16> to vector<48x4xbf16>
    %cst_18 = arith.constant dense<0.000000e+00> : vector<48x128xf32>
    %49 = tpu.matmul %48, %46, %cst_18 {dimension_numbers = #tpu.dot_dimension_numbers<[1], [0], [0], [1], [0, 0, 1, 1], [], []>} : vector<48x4xbf16>, vector<4x128xbf16>, vector<48x128xf32> -> vector<48x128xf32>
    %50 = arith.addf %41, %49 : vector<48x128xf32>
    %51 = vector.extract_strided_slice %40 {offsets = [3, 0, 0], sizes = [1, 4, 128], strides = [1, 1, 1]} : vector<9x4x128xbf16> to vector<1x4x128xbf16>
    %52 = vector.shape_cast %51 : vector<1x4x128xbf16> to vector<4x128xbf16>
    %53 = vector.extract_strided_slice %44 {offsets = [0, 1, 0, 0], sizes = [1, 6, 8, 4], strides = [1, 1, 1, 1]} : vector<1x8x8x4xbf16> to vector<1x6x8x4xbf16>
    %54 = vector.shape_cast %53 : vector<1x6x8x4xbf16> to vector<48x4xbf16>
    %cst_19 = arith.constant dense<0.000000e+00> : vector<48x128xf32>
    %55 = tpu.matmul %54, %52, %cst_19 {dimension_numbers = #tpu.dot_dimension_numbers<[1], [0], [0], [1], [0, 0, 1, 1], [], []>} : vector<48x4xbf16>, vector<4x128xbf16>, vector<48x128xf32> -> vector<48x128xf32>
    %56 = arith.addf %50, %55 : vector<48x128xf32>
    %57 = vector.extract_strided_slice %40 {offsets = [6, 0, 0], sizes = [1, 4, 128], strides = [1, 1, 1]} : vector<9x4x128xbf16> to vector<1x4x128xbf16>
    %58 = vector.shape_cast %57 : vector<1x4x128xbf16> to vector<4x128xbf16>
    %59 = vector.extract_strided_slice %44 {offsets = [0, 2, 0, 0], sizes = [1, 6, 8, 4], strides = [1, 1, 1, 1]} : vector<1x8x8x4xbf16> to vector<1x6x8x4xbf16>
    %60 = vector.shape_cast %59 : vector<1x6x8x4xbf16> to vector<48x4xbf16>
    %cst_20 = arith.constant dense<0.000000e+00> : vector<48x128xf32>
    %61 = tpu.matmul %60, %58, %cst_20 {dimension_numbers = #tpu.dot_dimension_numbers<[1], [0], [0], [1], [0, 0, 1, 1], [], []>} : vector<48x4xbf16>, vector<4x128xbf16>, vector<48x128xf32> -> vector<48x128xf32>
    %62 = arith.addf %56, %61 : vector<48x128xf32>
    %63 = vector.extract_strided_slice %40 {offsets = [1, 0, 0], sizes = [1, 4, 128], strides = [1, 1, 1]} : vector<9x4x128xbf16> to vector<1x4x128xbf16>
    %64 = vector.shape_cast %63 : vector<1x4x128xbf16> to vector<4x128xbf16>
    %65 = vector.extract_strided_slice %39 {offsets = [0, 0, 0, 0], sizes = [1, 6, 8, 4], strides = [1, 1, 1, 1]} : vector<1x8x8x4xbf16> to vector<1x6x8x4xbf16>
    %66 = vector.shape_cast %65 : vector<1x6x8x4xbf16> to vector<48x4xbf16>
    %cst_21 = arith.constant dense<0.000000e+00> : vector<48x128xf32>
    %67 = tpu.matmul %66, %64, %cst_21 {dimension_numbers = #tpu.dot_dimension_numbers<[1], [0], [0], [1], [0, 0, 1, 1], [], []>} : vector<48x4xbf16>, vector<4x128xbf16>, vector<48x128xf32> -> vector<48x128xf32>
    %68 = arith.addf %62, %67 : vector<48x128xf32>
    %69 = vector.extract_strided_slice %40 {offsets = [4, 0, 0], sizes = [1, 4, 128], strides = [1, 1, 1]} : vector<9x4x128xbf16> to vector<1x4x128xbf16>
    %70 = vector.shape_cast %69 : vector<1x4x128xbf16> to vector<4x128xbf16>
    %71 = vector.extract_strided_slice %39 {offsets = [0, 1, 0, 0], sizes = [1, 6, 8, 4], strides = [1, 1, 1, 1]} : vector<1x8x8x4xbf16> to vector<1x6x8x4xbf16>
    %72 = vector.shape_cast %71 : vector<1x6x8x4xbf16> to vector<48x4xbf16>
    %cst_22 = arith.constant dense<0.000000e+00> : vector<48x128xf32>
    %73 = tpu.matmul %72, %70, %cst_22 {dimension_numbers = #tpu.dot_dimension_numbers<[1], [0], [0], [1], [0, 0, 1, 1], [], []>} : vector<48x4xbf16>, vector<4x128xbf16>, vector<48x128xf32> -> vector<48x128xf32>
    %74 = arith.addf %68, %73 : vector<48x128xf32>
    %75 = vector.extract_strided_slice %40 {offsets = [7, 0, 0], sizes = [1, 4, 128], strides = [1, 1, 1]} : vector<9x4x128xbf16> to vector<1x4x128xbf16>
    %76 = vector.shape_cast %75 : vector<1x4x128xbf16> to vector<4x128xbf16>
    %77 = vector.extract_strided_slice %39 {offsets = [0, 2, 0, 0], sizes = [1, 6, 8, 4], strides = [1, 1, 1, 1]} : vector<1x8x8x4xbf16> to vector<1x6x8x4xbf16>
    %78 = vector.shape_cast %77 : vector<1x6x8x4xbf16> to vector<48x4xbf16>
    %cst_23 = arith.constant dense<0.000000e+00> : vector<48x128xf32>
    %79 = tpu.matmul %78, %76, %cst_23 {dimension_numbers = #tpu.dot_dimension_numbers<[1], [0], [0], [1], [0, 0, 1, 1], [], []>} : vector<48x4xbf16>, vector<4x128xbf16>, vector<48x128xf32> -> vector<48x128xf32>
    %80 = arith.addf %74, %79 : vector<48x128xf32>
    %81 = vector.extract_strided_slice %39 {offsets = [0, 0, 1, 0], sizes = [1, 8, 7, 4], strides = [1, 1, 1, 1]} : vector<1x8x8x4xbf16> to vector<1x8x7x4xbf16>
    %82 = tpu.concatenate %81, %42 in 2 : vector<1x8x7x4xbf16>, vector<1x8x1x4xbf16> -> vector<1x8x8x4xbf16>
    %83 = vector.extract_strided_slice %40 {offsets = [2, 0, 0], sizes = [1, 4, 128], strides = [1, 1, 1]} : vector<9x4x128xbf16> to vector<1x4x128xbf16>
    %84 = vector.shape_cast %83 : vector<1x4x128xbf16> to vector<4x128xbf16>
    %85 = vector.extract_strided_slice %82 {offsets = [0, 0, 0, 0], sizes = [1, 6, 8, 4], strides = [1, 1, 1, 1]} : vector<1x8x8x4xbf16> to vector<1x6x8x4xbf16>
    %86 = vector.shape_cast %85 : vector<1x6x8x4xbf16> to vector<48x4xbf16>
    %cst_24 = arith.constant dense<0.000000e+00> : vector<48x128xf32>
    %87 = tpu.matmul %86, %84, %cst_24 {dimension_numbers = #tpu.dot_dimension_numbers<[1], [0], [0], [1], [0, 0, 1, 1], [], []>} : vector<48x4xbf16>, vector<4x128xbf16>, vector<48x128xf32> -> vector<48x128xf32>
    %88 = arith.addf %80, %87 : vector<48x128xf32>
    %89 = vector.extract_strided_slice %40 {offsets = [5, 0, 0], sizes = [1, 4, 128], strides = [1, 1, 1]} : vector<9x4x128xbf16> to vector<1x4x128xbf16>
    %90 = vector.shape_cast %89 : vector<1x4x128xbf16> to vector<4x128xbf16>
    %91 = vector.extract_strided_slice %82 {offsets = [0, 1, 0, 0], sizes = [1, 6, 8, 4], strides = [1, 1, 1, 1]} : vector<1x8x8x4xbf16> to vector<1x6x8x4xbf16>
    %92 = vector.shape_cast %91 : vector<1x6x8x4xbf16> to vector<48x4xbf16>
    %cst_25 = arith.constant dense<0.000000e+00> : vector<48x128xf32>
    %93 = tpu.matmul %92, %90, %cst_25 {dimension_numbers = #tpu.dot_dimension_numbers<[1], [0], [0], [1], [0, 0, 1, 1], [], []>} : vector<48x4xbf16>, vector<4x128xbf16>, vector<48x128xf32> -> vector<48x128xf32>
    %94 = arith.addf %88, %93 : vector<48x128xf32>
    %95 = vector.extract_strided_slice %40 {offsets = [8, 0, 0], sizes = [1, 4, 128], strides = [1, 1, 1]} : vector<9x4x128xbf16> to vector<1x4x128xbf16>
    %96 = vector.shape_cast %95 : vector<1x4x128xbf16> to vector<4x128xbf16>
    %97 = vector.extract_strided_slice %82 {offsets = [0, 2, 0, 0], sizes = [1, 6, 8, 4], strides = [1, 1, 1, 1]} : vector<1x8x8x4xbf16> to vector<1x6x8x4xbf16>
    %98 = vector.shape_cast %97 : vector<1x6x8x4xbf16> to vector<48x4xbf16>
    %cst_26 = arith.constant dense<0.000000e+00> : vector<48x128xf32>
    %99 = tpu.matmul %98, %96, %cst_26 {dimension_numbers = #tpu.dot_dimension_numbers<[1], [0], [0], [1], [0, 0, 1, 1], [], []>} : vector<48x4xbf16>, vector<4x128xbf16>, vector<48x128xf32> -> vector<48x128xf32>
    %100 = arith.addf %94, %99 : vector<48x128xf32>
    %c0_27 = arith.constant 0 : index
    %c0_28 = arith.constant 0 : index
    %101 = vector.load %arg6[%c0_27, %c0_28] : memref<1x128xf32, #tpu.memory_space<vmem>>, vector<1x128xf32>
    %102 = vector.broadcast %101 : vector<1x128xf32> to vector<48x128xf32>
    %103 = arith.mulf %100, %102 : vector<48x128xf32>
    %c0_29 = arith.constant 0 : index
    %c0_30 = arith.constant 0 : index
    %104 = vector.load %arg7[%c0_29, %c0_30] : memref<1x128xf32, #tpu.memory_space<vmem>>, vector<1x128xf32>
    %105 = vector.broadcast %104 : vector<1x128xf32> to vector<48x128xf32>
    %106 = arith.addf %103, %105 : vector<48x128xf32>
    %cst_31 = arith.constant 0.000000e+00 : f32
    %107 = vector.broadcast %cst_31 : f32 to vector<48x128xf32>
    %108 = arith.maximumf %106, %107 : vector<48x128xf32>
    %109 = arith.truncf %108 : vector<48x128xf32> to vector<48x128xbf16>
    %110 = vector.shape_cast %109 : vector<48x128xbf16> to vector<1x6x8x128xbf16>
    %c0_i32_32 = arith.constant 0 : i32
    %111 = arith.cmpi sgt, %arg1, %c0_i32_32 : i32
    %112 = arith.extui %111 : i1 to i32
    %113 = arith.sitofp %112 : i32 to f32
    %114 = arith.truncf %113 : f32 to bf16
    %115 = vector.broadcast %114 : bf16 to vector<1x1x8x1xbf16>
    %c1_i32_33 = arith.constant 1 : i32
    %116 = arith.cmpi slt, %arg1, %c1_i32_33 : i32
    %117 = arith.extui %116 : i1 to i32
    %118 = arith.sitofp %117 : i32 to f32
    %119 = arith.truncf %118 : f32 to bf16
    %120 = vector.broadcast %119 : bf16 to vector<1x1x8x1xbf16>
    %cst_34 = arith.constant 1.000000e+00 : bf16
    %121 = vector.broadcast %cst_34 : bf16 to vector<1x4x8x1xbf16>
    %122 = tpu.concatenate %115, %121, %120 in 1 : vector<1x1x8x1xbf16>, vector<1x4x8x1xbf16>, vector<1x1x8x1xbf16> -> vector<1x6x8x1xbf16>
    %123 = vector.broadcast %122 : vector<1x6x8x1xbf16> to vector<1x6x8x128xbf16>
    %124 = arith.mulf %110, %123 : vector<1x6x8x128xbf16>
    %c0_35 = arith.constant 0 : index
    %c0_36 = arith.constant 0 : index
    %c0_37 = arith.constant 0 : index
    %125 = vector.load %arg8[%c0_35, %c0_36, %c0_37] : memref<9x128x128xbf16, #tpu.memory_space<vmem>>, vector<9x128x128xbf16>
    %cst_38 = arith.constant 0.000000e+00 : f32
    %126 = vector.broadcast %cst_38 : f32 to vector<32x128xf32>
    %cst_39 = arith.constant 0.000000e+00 : bf16
    %127 = vector.broadcast %cst_39 : bf16 to vector<1x6x1x128xbf16>
    %128 = vector.extract_strided_slice %124 {offsets = [0, 0, 0, 0], sizes = [1, 6, 7, 128], strides = [1, 1, 1, 1]} : vector<1x6x8x128xbf16> to vector<1x6x7x128xbf16>
    %129 = tpu.concatenate %127, %128 in 2 : vector<1x6x1x128xbf16>, vector<1x6x7x128xbf16> -> vector<1x6x8x128xbf16>
    %130 = vector.extract_strided_slice %125 {offsets = [0, 0, 0], sizes = [1, 128, 128], strides = [1, 1, 1]} : vector<9x128x128xbf16> to vector<1x128x128xbf16>
    %131 = vector.shape_cast %130 : vector<1x128x128xbf16> to vector<128x128xbf16>
    %132 = vector.extract_strided_slice %129 {offsets = [0, 0, 0, 0], sizes = [1, 4, 8, 128], strides = [1, 1, 1, 1]} : vector<1x6x8x128xbf16> to vector<1x4x8x128xbf16>
    %133 = vector.shape_cast %132 : vector<1x4x8x128xbf16> to vector<32x128xbf16>
    %cst_40 = arith.constant dense<0.000000e+00> : vector<32x128xf32>
    %134 = tpu.matmul %133, %131, %cst_40 {dimension_numbers = #tpu.dot_dimension_numbers<[1], [0], [0], [1], [0, 0, 1, 1], [], []>} : vector<32x128xbf16>, vector<128x128xbf16>, vector<32x128xf32> -> vector<32x128xf32>
    %135 = arith.addf %126, %134 : vector<32x128xf32>
    %136 = vector.extract_strided_slice %125 {offsets = [3, 0, 0], sizes = [1, 128, 128], strides = [1, 1, 1]} : vector<9x128x128xbf16> to vector<1x128x128xbf16>
    %137 = vector.shape_cast %136 : vector<1x128x128xbf16> to vector<128x128xbf16>
    %138 = vector.extract_strided_slice %129 {offsets = [0, 1, 0, 0], sizes = [1, 4, 8, 128], strides = [1, 1, 1, 1]} : vector<1x6x8x128xbf16> to vector<1x4x8x128xbf16>
    %139 = vector.shape_cast %138 : vector<1x4x8x128xbf16> to vector<32x128xbf16>
    %cst_41 = arith.constant dense<0.000000e+00> : vector<32x128xf32>
    %140 = tpu.matmul %139, %137, %cst_41 {dimension_numbers = #tpu.dot_dimension_numbers<[1], [0], [0], [1], [0, 0, 1, 1], [], []>} : vector<32x128xbf16>, vector<128x128xbf16>, vector<32x128xf32> -> vector<32x128xf32>
    %141 = arith.addf %135, %140 : vector<32x128xf32>
    %142 = vector.extract_strided_slice %125 {offsets = [6, 0, 0], sizes = [1, 128, 128], strides = [1, 1, 1]} : vector<9x128x128xbf16> to vector<1x128x128xbf16>
    %143 = vector.shape_cast %142 : vector<1x128x128xbf16> to vector<128x128xbf16>
    %144 = vector.extract_strided_slice %129 {offsets = [0, 2, 0, 0], sizes = [1, 4, 8, 128], strides = [1, 1, 1, 1]} : vector<1x6x8x128xbf16> to vector<1x4x8x128xbf16>
    %145 = vector.shape_cast %144 : vector<1x4x8x128xbf16> to vector<32x128xbf16>
    %cst_42 = arith.constant dense<0.000000e+00> : vector<32x128xf32>
    %146 = tpu.matmul %145, %143, %cst_42 {dimension_numbers = #tpu.dot_dimension_numbers<[1], [0], [0], [1], [0, 0, 1, 1], [], []>} : vector<32x128xbf16>, vector<128x128xbf16>, vector<32x128xf32> -> vector<32x128xf32>
    %147 = arith.addf %141, %146 : vector<32x128xf32>
    %148 = vector.extract_strided_slice %125 {offsets = [1, 0, 0], sizes = [1, 128, 128], strides = [1, 1, 1]} : vector<9x128x128xbf16> to vector<1x128x128xbf16>
    %149 = vector.shape_cast %148 : vector<1x128x128xbf16> to vector<128x128xbf16>
    %150 = vector.extract_strided_slice %124 {offsets = [0, 0, 0, 0], sizes = [1, 4, 8, 128], strides = [1, 1, 1, 1]} : vector<1x6x8x128xbf16> to vector<1x4x8x128xbf16>
    %151 = vector.shape_cast %150 : vector<1x4x8x128xbf16> to vector<32x128xbf16>
    %cst_43 = arith.constant dense<0.000000e+00> : vector<32x128xf32>
    %152 = tpu.matmul %151, %149, %cst_43 {dimension_numbers = #tpu.dot_dimension_numbers<[1], [0], [0], [1], [0, 0, 1, 1], [], []>} : vector<32x128xbf16>, vector<128x128xbf16>, vector<32x128xf32> -> vector<32x128xf32>
    %153 = arith.addf %147, %152 : vector<32x128xf32>
    %154 = vector.extract_strided_slice %125 {offsets = [4, 0, 0], sizes = [1, 128, 128], strides = [1, 1, 1]} : vector<9x128x128xbf16> to vector<1x128x128xbf16>
    %155 = vector.shape_cast %154 : vector<1x128x128xbf16> to vector<128x128xbf16>
    %156 = vector.extract_strided_slice %124 {offsets = [0, 1, 0, 0], sizes = [1, 4, 8, 128], strides = [1, 1, 1, 1]} : vector<1x6x8x128xbf16> to vector<1x4x8x128xbf16>
    %157 = vector.shape_cast %156 : vector<1x4x8x128xbf16> to vector<32x128xbf16>
    %cst_44 = arith.constant dense<0.000000e+00> : vector<32x128xf32>
    %158 = tpu.matmul %157, %155, %cst_44 {dimension_numbers = #tpu.dot_dimension_numbers<[1], [0], [0], [1], [0, 0, 1, 1], [], []>} : vector<32x128xbf16>, vector<128x128xbf16>, vector<32x128xf32> -> vector<32x128xf32>
    %159 = arith.addf %153, %158 : vector<32x128xf32>
    %160 = vector.extract_strided_slice %125 {offsets = [7, 0, 0], sizes = [1, 128, 128], strides = [1, 1, 1]} : vector<9x128x128xbf16> to vector<1x128x128xbf16>
    %161 = vector.shape_cast %160 : vector<1x128x128xbf16> to vector<128x128xbf16>
    %162 = vector.extract_strided_slice %124 {offsets = [0, 2, 0, 0], sizes = [1, 4, 8, 128], strides = [1, 1, 1, 1]} : vector<1x6x8x128xbf16> to vector<1x4x8x128xbf16>
    %163 = vector.shape_cast %162 : vector<1x4x8x128xbf16> to vector<32x128xbf16>
    %cst_45 = arith.constant dense<0.000000e+00> : vector<32x128xf32>
    %164 = tpu.matmul %163, %161, %cst_45 {dimension_numbers = #tpu.dot_dimension_numbers<[1], [0], [0], [1], [0, 0, 1, 1], [], []>} : vector<32x128xbf16>, vector<128x128xbf16>, vector<32x128xf32> -> vector<32x128xf32>
    %165 = arith.addf %159, %164 : vector<32x128xf32>
    %166 = vector.extract_strided_slice %124 {offsets = [0, 0, 1, 0], sizes = [1, 6, 7, 128], strides = [1, 1, 1, 1]} : vector<1x6x8x128xbf16> to vector<1x6x7x128xbf16>
    %167 = tpu.concatenate %166, %127 in 2 : vector<1x6x7x128xbf16>, vector<1x6x1x128xbf16> -> vector<1x6x8x128xbf16>
    %168 = vector.extract_strided_slice %125 {offsets = [2, 0, 0], sizes = [1, 128, 128], strides = [1, 1, 1]} : vector<9x128x128xbf16> to vector<1x128x128xbf16>
    %169 = vector.shape_cast %168 : vector<1x128x128xbf16> to vector<128x128xbf16>
    %170 = vector.extract_strided_slice %167 {offsets = [0, 0, 0, 0], sizes = [1, 4, 8, 128], strides = [1, 1, 1, 1]} : vector<1x6x8x128xbf16> to vector<1x4x8x128xbf16>
    %171 = vector.shape_cast %170 : vector<1x4x8x128xbf16> to vector<32x128xbf16>
    %cst_46 = arith.constant dense<0.000000e+00> : vector<32x128xf32>
    %172 = tpu.matmul %171, %169, %cst_46 {dimension_numbers = #tpu.dot_dimension_numbers<[1], [0], [0], [1], [0, 0, 1, 1], [], []>} : vector<32x128xbf16>, vector<128x128xbf16>, vector<32x128xf32> -> vector<32x128xf32>
    %173 = arith.addf %165, %172 : vector<32x128xf32>
    %174 = vector.extract_strided_slice %125 {offsets = [5, 0, 0], sizes = [1, 128, 128], strides = [1, 1, 1]} : vector<9x128x128xbf16> to vector<1x128x128xbf16>
    %175 = vector.shape_cast %174 : vector<1x128x128xbf16> to vector<128x128xbf16>
    %176 = vector.extract_strided_slice %167 {offsets = [0, 1, 0, 0], sizes = [1, 4, 8, 128], strides = [1, 1, 1, 1]} : vector<1x6x8x128xbf16> to vector<1x4x8x128xbf16>
    %177 = vector.shape_cast %176 : vector<1x4x8x128xbf16> to vector<32x128xbf16>
    %cst_47 = arith.constant dense<0.000000e+00> : vector<32x128xf32>
    %178 = tpu.matmul %177, %175, %cst_47 {dimension_numbers = #tpu.dot_dimension_numbers<[1], [0], [0], [1], [0, 0, 1, 1], [], []>} : vector<32x128xbf16>, vector<128x128xbf16>, vector<32x128xf32> -> vector<32x128xf32>
    %179 = arith.addf %173, %178 : vector<32x128xf32>
    %180 = vector.extract_strided_slice %125 {offsets = [8, 0, 0], sizes = [1, 128, 128], strides = [1, 1, 1]} : vector<9x128x128xbf16> to vector<1x128x128xbf16>
    %181 = vector.shape_cast %180 : vector<1x128x128xbf16> to vector<128x128xbf16>
    %182 = vector.extract_strided_slice %167 {offsets = [0, 2, 0, 0], sizes = [1, 4, 8, 128], strides = [1, 1, 1, 1]} : vector<1x6x8x128xbf16> to vector<1x4x8x128xbf16>
    %183 = vector.shape_cast %182 : vector<1x4x8x128xbf16> to vector<32x128xbf16>
    %cst_48 = arith.constant dense<0.000000e+00> : vector<32x128xf32>
    %184 = tpu.matmul %183, %181, %cst_48 {dimension_numbers = #tpu.dot_dimension_numbers<[1], [0], [0], [1], [0, 0, 1, 1], [], []>} : vector<32x128xbf16>, vector<128x128xbf16>, vector<32x128xf32> -> vector<32x128xf32>
    %185 = arith.addf %179, %184 : vector<32x128xf32>
    %c0_49 = arith.constant 0 : index
    %c0_50 = arith.constant 0 : index
    %186 = vector.load %arg9[%c0_49, %c0_50] : memref<1x128xf32, #tpu.memory_space<vmem>>, vector<1x128xf32>
    %187 = vector.broadcast %186 : vector<1x128xf32> to vector<32x128xf32>
    %188 = arith.mulf %185, %187 : vector<32x128xf32>
    %c0_51 = arith.constant 0 : index
    %c0_52 = arith.constant 0 : index
    %189 = vector.load %arg10[%c0_51, %c0_52] : memref<1x128xf32, #tpu.memory_space<vmem>>, vector<1x128xf32>
    %190 = vector.broadcast %189 : vector<1x128xf32> to vector<32x128xf32>
    %191 = arith.addf %188, %190 : vector<32x128xf32>
    %cst_53 = arith.constant 0.000000e+00 : f32
    %192 = vector.broadcast %cst_53 : f32 to vector<32x128xf32>
    %193 = arith.maximumf %191, %192 : vector<32x128xf32>
    %194 = vector.shape_cast %193 : vector<32x128xf32> to vector<1x4x8x128xf32>
    %195 = arith.truncf %194 : vector<1x4x8x128xf32> to vector<1x4x8x128xbf16>
    %c0_54 = arith.constant 0 : index
    %c0_55 = arith.constant 0 : index
    %c0_56 = arith.constant 0 : index
    %c0_57 = arith.constant 0 : index
    %196 = vector.load %arg11[%c0_54, %c0_55, %c0_56, %c0_57] : memref<1x4x8x128xbf16, #tpu.memory_space<vmem>>, vector<1x4x8x128xbf16>
    tpu.vector_store %arg11[%c0_54, %c0_55, %c0_56, %c0_57], %195 {strides = array<i32>} : memref<1x4x8x128xbf16, #tpu.memory_space<vmem>>, vector<1x4x8x128xbf16>,
    return
  }
  func.func @transform_0(%arg0: i32, %arg1: i32) -> (i32, i32, i32, i32, i32) {
    %c0_i32 = arith.constant 0 : i32
    %c0_i32_0 = arith.constant 0 : i32
    %c0_i32_1 = arith.constant 0 : i32
    %c0_i32_2 = arith.constant 0 : i32
    return %arg0, %arg1, %c0_i32, %c0_i32_0, %c0_i32_1 : i32, i32, i32, i32, i32
  }
  func.func @transform_1(%arg0: i32, %arg1: i32) -> (i32, i32, i32, i32, i32) {
    %c2_i32 = arith.constant 2 : i32
    %0 = arith.muli %arg1, %c2_i32 : i32
    %c1_i32 = arith.constant 1 : i32
    %1 = arith.subi %0, %c1_i32 : i32
    %c0_i32 = arith.constant 0 : i32
    %2 = arith.maxsi %1, %c0_i32 : i32
    %c0_i32_0 = arith.constant 0 : i32
    %c0_i32_1 = arith.constant 0 : i32
    %c0_i32_2 = arith.constant 0 : i32
    %c0_i32_3 = arith.constant 0 : i32
    return %arg0, %2, %c0_i32_0, %c0_i32_1, %c0_i32_2 : i32, i32, i32, i32, i32
  }
  func.func @transform_2(%arg0: i32, %arg1: i32) -> (i32, i32, i32, i32, i32) {
    %c1_i32 = arith.constant 1 : i32
    %0 = arith.addi %arg1, %c1_i32 : i32
    %c2_i32 = arith.constant 2 : i32
    %1 = arith.muli %0, %c2_i32 : i32
    %c3_i32 = arith.constant 3 : i32
    %2 = arith.minsi %1, %c3_i32 : i32
    %c0_i32 = arith.constant 0 : i32
    %c0_i32_0 = arith.constant 0 : i32
    %c0_i32_1 = arith.constant 0 : i32
    %c0_i32_2 = arith.constant 0 : i32
    return %arg0, %2, %c0_i32, %c0_i32_0, %c0_i32_1 : i32, i32, i32, i32, i32
  }
  func.func @transform_3(%arg0: i32, %arg1: i32) -> (i32, i32, i32) {
    %c0_i32 = arith.constant 0 : i32
    %c0_i32_0 = arith.constant 0 : i32
    %c0_i32_1 = arith.constant 0 : i32
    %c0_i32_2 = arith.constant 0 : i32
    return %c0_i32, %c0_i32_0, %c0_i32_1 : i32, i32, i32
  }
  func.func @transform_4(%arg0: i32, %arg1: i32) -> (i32, i32) {
    %c0_i32 = arith.constant 0 : i32
    %c0_i32_0 = arith.constant 0 : i32
    %c0_i32_1 = arith.constant 0 : i32
    return %c0_i32, %c0_i32_0 : i32, i32
  }
  func.func @transform_5(%arg0: i32, %arg1: i32) -> (i32, i32) {
    %c0_i32 = arith.constant 0 : i32
    %c0_i32_0 = arith.constant 0 : i32
    %c0_i32_1 = arith.constant 0 : i32
    return %c0_i32, %c0_i32_0 : i32, i32
  }
  func.func @transform_6(%arg0: i32, %arg1: i32) -> (i32, i32, i32) {
    %c0_i32 = arith.constant 0 : i32
    %c0_i32_0 = arith.constant 0 : i32
    %c0_i32_1 = arith.constant 0 : i32
    %c0_i32_2 = arith.constant 0 : i32
    return %c0_i32, %c0_i32_0, %c0_i32_1 : i32, i32, i32
  }
  func.func @transform_7(%arg0: i32, %arg1: i32) -> (i32, i32) {
    %c0_i32 = arith.constant 0 : i32
    %c0_i32_0 = arith.constant 0 : i32
    %c0_i32_1 = arith.constant 0 : i32
    return %c0_i32, %c0_i32_0 : i32, i32
  }
  func.func @transform_8(%arg0: i32, %arg1: i32) -> (i32, i32) {
    %c0_i32 = arith.constant 0 : i32
    %c0_i32_0 = arith.constant 0 : i32
    %c0_i32_1 = arith.constant 0 : i32
    return %c0_i32, %c0_i32_0 : i32, i32
  }
  func.func @transform_9(%arg0: i32, %arg1: i32) -> (i32, i32, i32, i32) {
    %c0_i32 = arith.constant 0 : i32
    %c0_i32_0 = arith.constant 0 : i32
    %c0_i32_1 = arith.constant 0 : i32
    return %arg0, %arg1, %c0_i32, %c0_i32_0 : i32, i32, i32, i32
  }
}

</mosaic_0001>

<bundles_post_ra>
// kernel: unet_downsampling_block.1
= control target key start
LH: loop header
LB: loop body
LE: loop exit
PB: predicated region body
PF: predicated region fallthrough
CT: control target
= control target key end

     0   :  { %s3880_s30 = smov 0   ;;  %s3882_s10 = smov 0   ;;  %s4660_s0 = inlined_call_operand.vmem [shape: bf16[2,8,2,8,8], index: 0, kind: input, shape index: {}, may-alias: {0,1,2}]   ;;  %s4661_s1 = inlined_call_operand.vmem [shape: bf16[2,8,2,8,8], index: 1, kind: input, shape index: {}, may-alias: {0,1,2}]   ;;  %s4662_s2 = inlined_call_operand.vmem [shape: bf16[2,8,2,8,8], index: 2, kind: input, shape index: {}, may-alias: {0,1,2}]   ;;  %s4663_s3 = inlined_call_operand.vmem [shape: bf16[9,4,128], index: 3, kind: input, shape index: {}]   ;;  %s4664_s4 = inlined_call_operand.vmem [shape: f32[1,128], index: 4, kind: input, shape index: {}]   ;;  %s4665_s5 = inlined_call_operand.vmem [shape: f32[1,128], index: 5, kind: input, shape index: {}]   ;;  %s4666_s6 = inlined_call_operand.vmem [shape: bf16[9,128,128], index: 6, kind: input, shape index: {}]   ;;  %s4667_s7 = inlined_call_operand.vmem [shape: f32[1,128], index: 7, kind: input, shape index: {}]   ;;  %s4668_s8 = inlined_call_operand.vmem [shape: f32[1,128], index: 8, kind: input, shape index: {}]   ;;  %s4669_s9 = inlined_call_operand.vmem [shape: bf16[2,8,8,128], index: 9, kind: output, shape index: {}]  }
   0x1   :  { %4670 = sst [smem:[#allocation4_spill]] %s4660_s0  ;;  %s3884_s11 = smov 0  }
   0x2   :  { %4671 = sst [smem:[#allocation5_spill]] %s4661_s1  ;;  %s3886_s12 = smov 0  }
   0x3   :  { %s3888_s13 = smov 0  }
   0x4 LB: > { %s28_s14 = sadd.s32 1, %s3816_s11  ;;  %s31_s15 = sadd.s32 1, %s3820_s12  ;;  %s3824_s13 = sphi %s3888_s13, %s19_s13   ;;  %s3820_s12 = sphi %s3886_s12, %s4685_s12   ;;  %s3816_s11 = sphi %s3884_s11, %s4684_s11   ;;  %s3812_s10 = sphi %s3882_s10, %s4683_s10   ;;  %s3808_s30 = sphi %s3880_s30, %s4682_s30  }
   0x5   : > { %p29_p0 = scmp.ge.s32.totalorder %s28_s14, 2  ;;  %p2905_p1 = scmp.ge.s32.totalorder %s3824_s13, 1 }
   0x6   : > { %p377_p2 = scmp.lt.s32.totalorder %s3824_s13, 5 }
   0x7   : > { %s4687_s14 = smov (%p29_p0, %s28_s14), 0  ;;  %s4689_s15 = smov (!%p29_p0, %s31_s15), %s3820_s12 }
   0x8   : > { %4672 = sst [smem:[#allocation2_spill]] %s4687_s14  ;;  %p378_p3 = pnand %p2905_p1, %p377_p2 }
   0x9   : > { %p33_p4 = scmp.ge.s32.totalorder %s4689_s15, 2  ;;  %p451_p5 = scmp.lt.s32.totalorder (!%p378_p3), %s3812_s10, 1  ;;  %v616_v15 = vld [vmem:[%s4663_s3 + $0x6] sm:$0x3] (!%p378_p3)  ;;  %vm746_vm0 = vcmask (!%p378_p3), 1041408   ;;  %v3827_v16 = vmov (!%p378_p3), 0.0  }
   0xa   : > { %381 = sbr.rel (%p378_p3) target bundleno = 1047 (0x417), region = 56  ;;  %s2910_s16 = sshll.u32 (!%p378_p3), %s3808_s30, 1  ;;  %3234 = vmatprep.subr.bf16.mxu0 (!%p378_p3), %v3827_v16  ;;  %v748_v17 = vsel (!%p378_p3), %vm746_vm0, %v616_v15, 0  ;;  %vm3828_vm1 = vmmov (!%p378_p3), 0   ;;  %vm710_vm2 = vcmask (!%p378_p3), 1040384   ;;  %vm1203_vm3 = vcmask (!%p378_p3), 1043456  }
   0xb   : > { %s4691_s15 = smov (%p33_p4, %s4689_s15), 0  ;;  %s2911_s17 = sadd.s32 (!%p378_p3), 4294967295, %s2910_s16  ;;  %3235 = vmatpush3.bf16.msra.mxu0 (!%p378_p3), %v748_v17  ;;  %3236 = vmatprep.mubr.msk.bf16.mxu0 (!%p378_p3), %vm3828_vm1, %v3827_v16  ;;  %vm1204_vm4 = vsmask.f32 (!%p378_p3), 3328  ;;  %vm711_vm5 = vsmask.f32 (!%p378_p3), 256 }
   0xc   : > { %4673 = sst [smem:[#allocation3_spill]] %s4691_s15  ;;  %p463_p6 = scmp.gt.s32.totalorder (!%p378_p3), %s2911_s17, 0  ;;  %3248 = vmatprep.subr.bf16.mxu0 (!%p378_p3), %v3827_v16  ;;  %vm736_vm6 = vcmask (!%p378_p3), 31744   ;;  %v613_v63 = vld [vmem:[%s4663_s3] sm:$0x3] (!%p378_p3)  ;;  %vm4039_vm7 = vmand (!%p378_p3), %vm710_vm2, %vm711_vm5 }
   0xd   : > { %s3090_s18 = sadd.s32 (!%p378_p3), 2, %s2910_s16  ;;  %s2906_s19 = sshll.u32 (!%p378_p3), %s3808_s30, 2  ;;  %vm4076_vm8 = vmand (!%p378_p3), %vm1203_vm3, %vm1204_vm4 }
   0xe   : > { %p482_p7 = scmp.lt.s32.totalorder (!%p378_p3), %s3090_s18, 3  ;;  %p453_p8 = scmp.lt.s32.totalorder (!%p378_p3), %s2906_s19, 7 }
   0xf   : > { %s4674_s0 = sld [smem:[#allocation4_spill]] (!%p378_p3)  ;;  %s4675_s1 = sld [smem:[#allocation5_spill]] (!%p378_p3) }
  0x10   : > { %p559_p11 = scmp.gt.s32.totalorder (!%p378_p3), %s3808_s30, 0  ;;  %p594_p12 = scmp.lt.s32.totalorder (!%p378_p3), %s3808_s30, 1 }
  0x11   : > { %s4693_s10 = smov (!%p451_p5, %s3812_s10), 1  ;;  %s4695_s17 = smov (!%p463_p6, %s2911_s17), 0 }
  0x12   : > { %s2912_s20 = sshll.u32 %s4695_s17, 1  ;;  %s3917_s21 = sshll.u32 %s4693_s10, 4 }
  0x13   : > { %p468_p9 = scmp.lt.s32.totalorder %s2912_s20, 7  ;;  %s4697_s19 = smov (!%p453_p8, %s2906_s19), 7 }
  0x14   : > { %s2907_s22 = sshll.u32 %s4697_s19, 1  ;;  %s4701_s18 = smov (!%p482_p7, %s3090_s18), 3 }
  0x15   : > { %s4699_s20 = smov (!%p468_p9, %s2912_s20), 7  ;;  %s457_s24 = sadd.s32 %s3917_s21, %s2907_s22 }
  0x16   : > { %s2913_s23 = sshll.u32 %s4699_s20, 1  ;;  %s2909_s26 = sshll.u32 %s457_s24, 2 }
  0x17   : > { %s472_s25 = sadd.s32 %s2913_s23, %s3917_s21  ;;  %s459_s16 = scalar_lea.vmem %s4674_s0, %s2909_s26 }
  0x18   : > { %s2915_s27 = sshll.u32 %s472_s25, 2  ;;  %v513_v0 = vld [vmem:[%s459_s16 + $0x8] sm:$0xf]  ;;  %v514_v1 = vld [vmem:[%s459_s16 + $0xc] sm:$0xf]  ;;  %s3826_s20 = smov 124  }
  0x19   : > { %s3930_s14 = scalar_lea.vmem %s4675_s1, %s2915_s27  ;;  %v511_v2 = vld [vmem:[%s459_s16] sm:$0xf]  ;;  %v3934_v5 = vmax.bf16 %v514_v1, %v513_v0  ;;  %v512_v6 = vld [vmem:[%s459_s16 + $0x4] sm:$0xf]  ;;  %v515_v8 = vld [vmem:[%s459_s16 + $0x10] sm:$0xf] }
  0x1a   : > { %v545_v3 = vld [vmem:[%s3930_s14 + $0x8] sm:$0xf]  ;;  %v546_v4 = vld [vmem:[%s3930_s14 + $0xc] sm:$0xf]  ;;  %v516_v9 = vld [vmem:[%s459_s16 + $0x14] sm:$0xf]  ;;  %v3945_v12 = vmax.bf16 %v512_v6, %v511_v2 }
  0x1b   : > { %v3936_v7 = vmax.bf16 %v546_v4, %v545_v3  ;;  %529 = vrot.lane.b32.xlu1 %v3934_v5, %s3826_s20  ;;  %v3941_v10 = vmax.bf16 %v516_v9, %v515_v8  ;;  %v517_v11 = vld [vmem:[%s459_s16 + $0x18] sm:$0xf]  ;;  %s2917_s15 = sshll.u32 %s4701_s18, 1  ;;  %v518_v13 = vld [vmem:[%s459_s16 + $0x1c] sm:$0xf] }
  0x1c   : > { %p487_p10 = scmp.lt.s32.totalorder %s2917_s15, 7  ;;  %v3949_v14 = vmax.bf16 %v518_v13, %v517_v11  ;;  %v543_v18 = vld [vmem:[%s3930_s14] sm:$0xf]  ;;  %v544_v19 = vld [vmem:[%s3930_s14 + $0x4] sm:$0xf] }
  0x1d   : > { %553 = vrot.lane.b32.xlu0 %v3936_v7, %s3826_s20  ;;  %v3975_v26 = vmax.bf16 %v544_v19, %v543_v18  ;;  %s560_s14 = scalar_select %p559_p11, 1, 0 }
  0x1e   : > { %s4703_s15 = smov (!%p487_p10, %s2917_s15), 7 }
  0x1f   : > { %531 = vrot.lane.b32.xlu1 %v3941_v10, %s3826_s20  ;;  %s2918_s18 = sshll.u32 %s4703_s15, 1 }
  0x20   : > { %s491_s24 = sadd.s32 %s2918_s18, %s3917_s21  ;;  %s561_s21 = scvt.s32.f32 %s560_s14 }
  0x21   : > { %527 = vrot.lane.b32.xlu0 %v3945_v12, %s3826_s20  ;;  %s2920_s25 = sshll.u32 %s491_s24, 2 }
  0x22   : > { %s493_s28 = scalar_lea.vmem %s4662_s2, %s2920_s25  ;;  %s564_s29 = sshrl.u32 %s561_s21, 16 }
  0x23   : > { %533 = vrot.lane.b32.xlu1 %v3949_v14, %s3826_s20  ;;  %v578_v20 = vld [vmem:[%s493_s28] sm:$0xf]  ;;  %v579_v21 = vld [vmem:[%s493_s28 + $0x4] sm:$0xf]  ;;  %v580_v22 = vld [vmem:[%s493_s28 + $0x8] sm:$0xf]  ;;  %p563_p13 = scmp.ne.f32.partialorder %s561_s21, %s561_s21 }
  0x24   : > { %v3969_v23 = vmax.bf16 %v579_v21, %v578_v20  ;;  %v581_v24 = vld [vmem:[%s493_s28 + $0xc] sm:$0xf]  ;;  %s565_s16 = sand.u32 1, %s564_s29 }
  0x25   : > { %v3971_v25 = vmax.bf16 %v581_v24, %v580_v22  ;;  %s595_s17 = scalar_select %p594_p12, 1, 0 }
  0x26   : > { %586 = vrot.lane.b32.xlu0 %v3969_v23, %s3826_s20  ;;  %s566_s15 = sadd.s32 32767, %s565_s16 }
  0x27   : > { %588 = vrot.lane.b32.xlu1 %v3971_v25, %s3826_s20  ;;  %s567_s22 = sadd.s32 %s566_s15, %s561_s21  ;;  %s596_s23 = scvt.s32.f32 %s595_s17 }
  0x28   : > { %s568_s18 = sand.u32 4294901760, %s567_s22  ;;  %s2922_s17 = sshll.u32 %s4693_s10, 3 }
  0x29   : > { %s599_s24 = sshrl.u32 %s596_s23, 16  ;;  %s4705_s18 = smov (%p563_p13, %s568_s18), 2143289344 }
  0x2a   : > { %551 = vrot.lane.b32.xlu0 %v3975_v26, %s3826_s20  ;;  %s600_s25 = sand.u32 1, %s599_s24  ;;  %s571_s27 = sshrl.u32 %s4705_s18, 16 }
  0x2b   : > { %s601_s26 = sadd.s32 32767, %s600_s25  ;;  %s572_s0 = sshll.u32 %s571_s27, 16 }
  0x2c   : > { %s602_s28 = sadd.s32 %s601_s26, %s596_s23  ;;  %p598_p0 = scmp.ne.f32.partialorder %s596_s23, %s596_s23 }
  0x2d   : > { %s603_s20 = sand.u32 4294901760, %s602_s28  ;;  %s573_s1 = sor.u32 %s572_s0, %s571_s27 }
  0x2e   : > { %s4707_s20 = smov (%p598_p0, %s603_s20), 2143289344  ;;  %v3985_v28 = vstv %s573_s1  ;;  %s505_s23 = sadd.s32 %s2922_s17, %s4697_s19 }
  0x2f   : > { %s606_s0 = sshrl.u32 %s4707_s20, 16  ;;  %s2923_s18 = sshll.u32 %s505_s23, 2 }
  0x30   : > { %s607_s1 = sshll.u32 %s606_s0, 16  ;;  %s507_s25 = scalar_lea.vmem %s4669_s9, %s2923_s18 }
  0x31   : > { %s608_s30 = sor.u32 %s607_s1, %s606_s0 }
  0x32   : > { %v4029_v1 = vstv %s608_s30 }
  0x8d   : > { %v530_v27 = vpop.permute.xlu1 %529 }
  0x8e   : > { %v3988_v30 = vmax.bf16 %v530_v27, %v3934_v5  ;;  %v3735_v5 = vld [vmem:[%s4666_s6 + $0x1a8] sm:$0xff]  }
  0x8f   : > { %v554_v29 = vpop.permute.xlu0 %553 }
  0x90   : > { %v558_v31 = vmax.bf16 %v554_v29, %v3936_v7  ;;  %v3993_v32 = vcombine.low %v3988_v30, %v3988_v30 }
  0x91   : > { %v532_v34 = vpop.permute.xlu1 %531 }
  0x92   : > { %v3996_v33 = vmul.bf16 %v3985_v28, %v558_v31  ;;  %v671_v35 = vshll.u32 %v3993_v32, 16  ;;  %v4001_v37 = vmax.bf16 %v532_v34, %v3941_v10  ;;  %v668_v40 = vshrl.u32 %v3993_v32, 16 }
  0x93   : > { %v528_v36 = vpop.permute.xlu0 %527 }
  0x94   : > { %v2925_v38 = vcombine.low %v3996_v33, %v3996_v33  ;;  %v4006_v39 = vmax.bf16 %v528_v36, %v3945_v12  ;;  %v1185_v41 = vrot.slane %v671_v35, 1  ;;  %v2928_v42 = vcombine.low %v4001_v37, %v4001_v37 }
  0x95   : > { %v2955_v43 = vcombine.low %v3988_v30, %v4001_v37  ;;  %v534_v48 = vpop.permute.xlu1 %533  ;;  %v670_v6 = vrot.slane %v668_v40, 7 }
  0x96   : > { %v654_v44 = vshrl.u32 %v2925_v38, 16  ;;  %v657_v45 = vshll.u32 %v2925_v38, 16  ;;  %v2926_v46 = vcombine.low %v4006_v39, %v4006_v39  ;;  %v4017_v47 = vcombine.low %v4006_v39, %v3988_v30  ;;  %v618_v30 = vld [vmem:[%s4663_s3 + $0xa] sm:$0x3] }
  0x97   : > { %v4019_v49 = vor.u32 %v1185_v41, %v668_v40  ;;  %v2954_v50 = vcombine.low %v3996_v33, %v4006_v39  ;;  %v675_v51 = vshrl.u32 %v2928_v42, 16  ;;  %v678_v57 = vshll.u32 %v2928_v42, 16  ;;  %v621_v39 = vld [vmem:[%s4663_s3 + $0x10] sm:$0x3] }
  0x98   : > { %v656_v52 = vrot.slane %v654_v44, 7  ;;  %v1181_v53 = vrot.slane %v657_v45, 1  ;;  %v661_v54 = vshrl.u32 %v2926_v46, 16  ;;  %v664_v55 = vshll.u32 %v2926_v46, 16  ;;  %v587_v2 = vpop.permute.xlu0 %586 }
  0x99   : > { %v677_v56 = vrot.slane %v675_v51, 7  ;;  %v4024_v58 = vmax.bf16 %v534_v48, %v3949_v14  ;;  %v1187_v0 = vrot.slane %v678_v57, 1  ;;  %v592_v9 = vmax.bf16 %v587_v2, %v3969_v23  ;;  %v589_v10 = vpop.permute.xlu1 %588 }
  0x9a   : > { %v1182_v59 = vor.u32 %v1181_v53, %v654_v44  ;;  %v663_v60 = vrot.slane %v661_v54, 7  ;;  %v1183_v61 = vrot.slane %v664_v55, 1  ;;  %v659_v62 = vor.u32 %v657_v45, %v656_v52 }
  0x9b   : > { %v2929_v3 = vcombine.low %v4024_v58, %v4024_v58  ;;  %v4035_v4 = vcombine.low %v4001_v37, %v4024_v58  ;;  %v1188_v11 = vor.u32 %v1187_v0, %v675_v51  ;;  %v593_v13 = vmax.bf16 %v589_v10, %v3971_v25 }
  0x9c   : > { %v666_v7 = vor.u32 %v664_v55, %v663_v60  ;;  %v1184_v8 = vor.u32 %v1183_v61, %v661_v54  ;;  %v822_v14 = vsel %vm746_vm0, %v613_v63, 0  ;;  %v680_v15 = vor.u32 %v678_v57, %v677_v56  ;;  %v552_v22 = vpop.permute.xlu0 %551 }
  0x9d   : > { %v685_v12 = vshll.u32 %v2929_v3, 16  ;;  %v4047_v17 = vmul.bf16 %v4029_v1, %v592_v9  ;;  %v4051_v18 = vsel %vm4039_vm7, 0, %v659_v62  ;;  %v682_v20 = vshrl.u32 %v2929_v3, 16 }
  0x9e   : > { %v4055_v19 = vsel %vm4039_vm7, 0, %v666_v7  ;;  %v4058_v23 = vmul.bf16 %v4029_v1, %v593_v13  ;;  %v673_v25 = vor.u32 %v671_v35, %v670_v6  ;;  %v557_v31 = vmax.bf16 %v552_v22, %v3975_v26  ;;  %v3736_v35 = vld [vmem:[%s4666_s6 + $0x1b0] sm:$0xff]  }
  0x9f   : > { %v1189_v21 = vrot.slane %v685_v12, 1  ;;  %v2932_v24 = vcombine.low %v4051_v18, %v4055_v19  ;;  %v2930_v27 = vcombine.low %v4047_v17, %v4047_v17  ;;  %v2956_v29 = vcombine.low %v4024_v58, %v4047_v17  ;;  %v3717_v58 = vld [vmem:[%s4666_s6 + $0x10] sm:$0xff]  }
  0xa0   : > { %v4069_v34 = vcombine.low %v4058_v23, %v4058_v23  ;;  %v2960_v36 = vcombine.low %v4047_v17, %v4058_v23  ;;  %v4081_v40 = vmul.bf16 %v3985_v28, %v557_v31  ;;  %v717_v42 = vsel %vm4039_vm7, 0, %v680_v15  ;;  %v3721_v17 = vld [vmem:[%s4666_s6 + $0x20] sm:$0xff]   ;;  %v3722_v23 = vld [vmem:[%s4666_s6 + $0xd8] sm:$0xff]  }
  0xa1   : > { %v1190_v32 = vor.u32 %v1189_v21, %v682_v20  ;;  %3237 = vmatmul.mubr.msk.bf16.vlgmr.msra.gmra.mrb[0].mxu0 %vm736_vm6, %v2932_v24  ;;  %v689_v38 = vshrl.u32 %v2930_v27, 16  ;;  %v692_v26 = vshll.u32 %v2930_v27, 16  ;;  %v716_v46 = vsel %vm4039_vm7, 0, %v673_v25 }
  0xa2   : > { %3249 = vmatpush3.bf16.msra.mxu0 %v822_v14  ;;  %3240 = vmatprep.mubr.msk.bf16.mxu0 %vm3828_vm1, %v3827_v16  ;;  %v699_v41 = vshll.u32 %v4069_v34, 16  ;;  %v2924_v45 = vcombine.low %v4081_v40, %v4081_v40  ;;  %v4095_v48 = vsel %vm4076_vm8, %v1182_v59, 0  ;;  %v696_v51 = vshrl.u32 %v4069_v34, 16 }
  0xa3   : > { %3262 = vmatprep.subr.bf16.mxu0 %v3827_v16  ;;  %v691_v44 = vrot.slane %v689_v38, 7  ;;  %v4102_v53 = vsel %vm4076_vm8, %v1184_v8, 0  ;;  %v684_v54 = vrot.slane %v682_v20, 7  ;;  %v2933_v56 = vcombine.low %v716_v46, %v717_v42 }
  0xa4   : > { %v1193_v52 = vrot.slane %v699_v41, 1  ;;  %v650_v55 = vshll.u32 %v2924_v45, 16  ;;  %v4107_v57 = vsel %vm4076_vm8, %v4019_v49, 0  ;;  %v1191_v60 = vrot.slane %v692_v26, 1 }
  0xa5   : > { %v4111_v61 = vcombine.low %v4102_v53, %v4107_v57  ;;  %v2970_v62 = vcombine.low %v4095_v48, %v4102_v53  ;;  %v647_v63 = vshrl.u32 %v2924_v45, 16  ;;  %v694_v2 = vor.u32 %v692_v26, %v691_v44  ;;  %v3726_v53 = vld [vmem:[%s4666_s6 + $0xe8] sm:$0xff]  }
  0xa6   : > { %v1194_v59 = vor.u32 %v1193_v52, %v696_v51  ;;  %v1179_v0 = vrot.slane %v650_v55, 1  ;;  %v4117_v3 = vsel %vm4076_vm8, %v1188_v11, 0  ;;  %v4122_v49 = vsel %vm4076_vm8, %v1190_v32, 0  ;;  %v619_v32 = vld [vmem:[%s4663_s3 + $0xc] sm:$0x3] }
  0xa7   : > { %v2971_v6 = vcombine.low %v4107_v57, %v4117_v3  ;;  %v687_v7 = vor.u32 %v685_v12, %v684_v54  ;;  %v4130_v9 = vcombine.low %v4117_v3, %v4122_v49  ;;  %v1192_v10 = vor.u32 %v1191_v60, %v689_v38  ;;  %v3727_v57 = vld [vmem:[%s4666_s6 + $0x38] sm:$0xff]  }
  0xa8   : > { %v1180_v8 = vor.u32 %v1179_v0, %v647_v63  ;;  %v1213_v11 = vsel %vm4076_vm8, %v1194_v59, 0  ;;  %v649_v13 = vrot.slane %v647_v63, 7  ;;  %v719_v15 = vsel %vm4039_vm7, 0, %v694_v2  ;;  %v3728_v59 = vld [vmem:[%s4666_s6 + $0xf0] sm:$0xff]   ;;  %v2980_v63 = vld [vmem:[%s4664_s4] ss:$0 sm:$0xff] }
  0xa9   : > { %3241 = vmatmul.mubr.msk.bf16.gmra.mrb[4].mxu0 %vm736_vm6, %v2933_v56  ;;  %v4143_v20 = vsel %vm4076_vm8, %v1192_v10, 0  ;;  %v718_v21 = vsel %vm4039_vm7, 0, %v687_v7  ;;  %v888_v26 = vsel %vm746_vm0, %v619_v32, 0  ;;  %v2939_v44 = vcombine.low %v4055_v19, %v716_v46  ;;  %v620_v56 = vld [vmem:[%s4663_s3 + $0xe] sm:$0x3] }
  0xaa   : > { %3244 = vmatprep.mubr.msk.bf16.mxu0 %vm3828_vm1, %v3827_v16  ;;  %v1206_v14 = vsel %vm4076_vm8, %v1180_v8, 0  ;;  %v2972_v22 = vcombine.low %v4122_v49, %v4143_v20  ;;  %v4150_v24 = vcombine.low %v4143_v20, %v1213_v11  ;;  %v2934_v25 = vcombine.low %v718_v21, %v719_v15  ;;  %v2981_v2 = vld [vmem:[%s4665_s5] ss:$0 sm:$0xff] }
  0xab   : > { %v4139_v12 = vcombine.low %v1206_v14, %v4095_v48  ;;  %v652_v27 = vor.u32 %v650_v55, %v649_v13  ;;  %v2940_v45 = vcombine.low %v717_v42, %v718_v21  ;;  %v698_v19 = vrot.slane %v696_v51, 7  ;;  %v617_v51 = vld [vmem:[%s4663_s3 + $0x8] sm:$0x3]  ;;  %v3714_v55 = vld [vmem:[%s4666_s6] sm:$0xff]   ;;  %v3725_v48 = vld [vmem:[%s4666_s6 + $0x30] sm:$0xff]  }
  0xac   : > { %v2948_v34 = vcombine.low %v4081_v40, %v3996_v33  ;;  %v3829_v40 = vmov 0   ;;  %3380 = vmatprep.subr.bf16.mxu1 %v3714_v55  ;;  %v1114_v60 = vsel %vm746_vm0, %v620_v56, 0  ;;  %v1319_v37 = vsel %vm746_vm0, %v618_v30, 0 }
  0xad   : > { %v713_v31 = vsel %vm4039_vm7, 0, %v652_v27  ;;  %v701_v42 = vor.u32 %v699_v41, %v698_v19  ;;  %v1044_v41 = vsel %vm746_vm0, %v617_v51, 0  ;;  %3712 = vset.pattern.permute.xlu0 %v3829_v40  ;;  %3713 = vset.pattern.permute.xlu1 %v3829_v40 }
  0xae   : > { %v2938_v38 = vcombine.low %v713_v31, %v4051_v18  ;;  %v614_v18 = vld [vmem:[%s4663_s3 + $0x2] sm:$0x3]  ;;  %1513 = vperm.xlu0 %3712, %v3985_v28   ;;  %1522 = vperm.xlu1 %3713, %v4029_v1   ;;  %v615_v28 = vld [vmem:[%s4663_s3 + $0x4] sm:$0x3]  ;;  %v3719_v1 = vld [vmem:[%s4666_s6 + $0x18] sm:$0xff]  }
  0xaf   : > { %v966_v52 = vsel %vm746_vm0, %v614_v18, 0  ;;  %v720_v46 = vsel %vm4039_vm7, 0, %v701_v42  ;;  %3381 = vmatpush3.bf16.msra.mxu1 %v3714_v55  ;;  %v1239_v33 = vsel %vm746_vm0, %v615_v28, 0 }
  0xb0   : > { %v2944_v54 = vcombine.low %v719_v15, %v720_v46 }
  0xb1   : > { %3245 = vmatmul.mubr.msk.bf16.gmra.mrb[8].mxu0 %vm736_vm6, %v2934_v25 }
  0xb2   : > { %3250 = vmatprep.mubr.msk.bf16.mxu0 %vm3828_vm1, %v3827_v16 }
  0xb9   : > { %3251 = vmatmul.mubr.msk.bf16.vlgmr.msra.gmra.mrb[0].mxu0 %vm736_vm6, %v2938_v38 }
  0xba   : > { %3263 = vmatpush3.bf16.msra.mxu0 %v888_v26  ;;  %3254 = vmatprep.mubr.msk.bf16.mxu0 %vm3828_vm1, %v3827_v16 }
  0xbb   : > { %3276 = vmatprep.subr.bf16.mxu0 %v3827_v16 }
  0xc1   : > { %3255 = vmatmul.mubr.msk.bf16.gmra.mrb[4].mxu0 %vm736_vm6, %v2939_v44 }
  0xc2   : > { %3258 = vmatprep.mubr.msk.bf16.mxu0 %vm3828_vm1, %v3827_v16 }
  0xc9   : > { %3259 = vmatmul.mubr.msk.bf16.gmra.mrb[8].mxu0 %vm736_vm6, %v2940_v45 }
  0xca   : > { %3264 = vmatprep.mubr.msk.bf16.mxu0 %vm3828_vm1, %v3827_v16 }
  0xd1   : > { %3265 = vmatmul.mubr.msk.bf16.vlgmr.msra.gmra.mrb[0].mxu0 %vm736_vm6, %v2939_v44 }
  0xd2   : > { %3277 = vmatpush3.bf16.msra.mxu0 %v966_v52  ;;  %3268 = vmatprep.mubr.msk.bf16.mxu0 %vm3828_vm1, %v3827_v16 }
  0xd3   : > { %3290 = vmatprep.subr.bf16.mxu0 %v3827_v16 }
  0xd9   : > { %3269 = vmatmul.mubr.msk.bf16.gmra.mrb[4].mxu0 %vm736_vm6, %v2940_v45 }
  0xda   : > { %3272 = vmatprep.mubr.msk.bf16.mxu0 %vm3828_vm1, %v3827_v16 }
  0xe1   : > { %3273 = vmatmul.mubr.msk.bf16.gmra.mrb[8].mxu0 %vm736_vm6, %v2944_v54 }
  0xe2   : > { %3278 = vmatprep.mubr.msk.bf16.mxu0 %vm3828_vm1, %v3827_v16 }
  0xe9   : > { %3279 = vmatmul.mubr.msk.bf16.vlgmr.msra.gmra.mrb[0].mxu0 %vm736_vm6, %v2948_v34 }
  0xea   : > { %3291 = vmatpush3.bf16.msra.mxu0 %v1044_v41  ;;  %3282 = vmatprep.mubr.msk.bf16.mxu0 %vm3828_vm1, %v3827_v16 }
  0xeb   : > { %3304 = vmatprep.subr.bf16.mxu0 %v3827_v16 }
  0xf1   : > { %3283 = vmatmul.mubr.msk.bf16.gmra.mrb[4].mxu0 %vm736_vm6, %v4017_v47 }
  0xf2   : > { %3286 = vmatprep.mubr.msk.bf16.mxu0 %vm3828_vm1, %v3827_v16 }
  0xf9   : > { %3287 = vmatmul.mubr.msk.bf16.gmra.mrb[8].mxu0 %vm736_vm6, %v4035_v4 }
  0xfa   : > { %3292 = vmatprep.mubr.msk.bf16.mxu0 %vm3828_vm1, %v3827_v16 }
 0x101   : > { %3293 = vmatmul.mubr.msk.bf16.vlgmr.msra.gmra.mrb[0].mxu0 %vm736_vm6, %v2954_v50  ;;  %v3716_v50 = vld [vmem:[%s4666_s6 + $0xc0] sm:$0xff]  }
 0x102   : > { %3305 = vmatpush3.bf16.msra.mxu0 %v1114_v60  ;;  %3296 = vmatprep.mubr.msk.bf16.mxu0 %vm3828_vm1, %v3827_v16 }
 0x103   : > { %3318 = vmatprep.subr.bf16.mxu0 %v3827_v16 }
 0x109   : > { %3297 = vmatmul.mubr.msk.bf16.gmra.mrb[4].mxu0 %vm736_vm6, %v2955_v43  ;;  %v1391_v43 = vsel %vm746_vm0, %v621_v39, 0 }
 0x10a   : > { %3300 = vmatprep.mubr.msk.bf16.mxu0 %vm3828_vm1, %v3827_v16 }
 0x111   : > { %3301 = vmatmul.mubr.msk.bf16.gmra.mrb[8].mxu0 %vm736_vm6, %v2956_v29  ;;  %v3723_v29 = vld [vmem:[%s4666_s6 + $0x28] sm:$0xff]  }
 0x112   : > { %3306 = vmatprep.mubr.msk.bf16.mxu0 %vm3828_vm1, %v3827_v16 }
 0x119   : > { %3307 = vmatmul.mubr.msk.bf16.vlgmr.msra.gmra.mrb[0].mxu0 %vm736_vm6, %v4017_v47  ;;  %v3715_v47 = vld [vmem:[%s4666_s6 + $0x8] sm:$0xff]  }
 0x11a   : > { %3319 = vmatpush3.bf16.msra.mxu0 %v1239_v33  ;;  %3310 = vmatprep.mubr.msk.bf16.mxu0 %vm3828_vm1, %v3827_v16 }
 0x11b   : > { %3332 = vmatprep.subr.bf16.mxu0 %v3827_v16  ;;  %3382 = vmatprep.subr.bf16.mxu1 %v3715_v47 }
 0x11c   : > { %3383 = vmatpush3.bf16.msra.mxu1 %v3715_v47 }
 0x11d   : > { %3384 = vmatprep.subr.bf16.mxu1 %v3717_v58 }
 0x120   : > { %3385 = vmatpush3.bf16.msra.mxu1 %v3717_v58 }
 0x121   : > { %3311 = vmatmul.mubr.msk.bf16.gmra.mrb[4].mxu0 %vm736_vm6, %v4035_v4  ;;  %3386 = vmatprep.subr.bf16.mxu1 %v3719_v1  ;;  %v3720_v4 = vld [vmem:[%s4666_s6 + $0xd0] sm:$0xff]  }
 0x122   : > { %3314 = vmatprep.mubr.msk.bf16.mxu0 %vm3828_vm1, %v3827_v16 }
 0x124   : > { %3387 = vmatpush3.bf16.msra.mxu1 %v3719_v1 }
 0x125   : > { %3388 = vmatprep.subr.bf16.mxu1 %v3721_v17 }
 0x128   : > { %3389 = vmatpush3.bf16.msra.mxu1 %v3721_v17 }
 0x129   : > { %3315 = vmatmul.mubr.msk.bf16.gmra.mrb[8].mxu0 %vm736_vm6, %v2960_v36  ;;  %3390 = vmatprep.subr.bf16.mxu1 %v3723_v29  ;;  %v3724_v36 = vld [vmem:[%s4666_s6 + $0xe0] sm:$0xff]  }
 0x12a   : > { %3320 = vmatprep.mubr.msk.bf16.mxu0 %vm3828_vm1, %v3827_v16 }
 0x12c   : > { %3391 = vmatpush3.bf16.msra.mxu1 %v3723_v29 }
 0x12d   : > { %3392 = vmatprep.subr.bf16.mxu1 %v3725_v48  ;;  %v1514_v13 = vpop.permute.xlu0 %1513 }
 0x130   : > { %3393 = vmatpush3.bf16.msra.mxu1 %v3725_v48 }
 0x131   : > { %3321 = vmatmul.mubr.msk.bf16.vlgmr.msra.gmra.mrb[0].mxu0 %vm736_vm6, %v4139_v12  ;;  %3394 = vmatprep.subr.bf16.mxu1 %v3727_v57 }
 0x132   : > { %3333 = vmatpush3.bf16.msra.mxu0 %v1319_v37  ;;  %3324 = vmatprep.mubr.msk.bf16.mxu0 %vm3828_vm1, %v3827_v16 }
 0x133   : > { %3346 = vmatprep.subr.bf16.mxu0 %v3827_v16 }
 0x134   : > { %3395 = vmatpush3.bf16.msra.mxu1 %v3727_v57 }
 0x139   : > { %3325 = vmatmul.mubr.msk.bf16.gmra.mrb[4].mxu0 %vm736_vm6, %v4111_v61 }
 0x13a   : > { %3328 = vmatprep.mubr.msk.bf16.mxu0 %vm3828_vm1, %v3827_v16 }
 0x141   : > { %3329 = vmatmul.mubr.msk.bf16.gmra.mrb[8].mxu0 %vm736_vm6, %v4130_v9 }
 0x142   : > { %3334 = vmatprep.mubr.msk.bf16.mxu0 %vm3828_vm1, %v3827_v16 }
 0x149   : > { %3335 = vmatmul.mubr.msk.bf16.vlgmr.msra.gmra.mrb[0].mxu0 %vm736_vm6, %v2970_v62  ;;  %v3730_v62 = vld [vmem:[%s4666_s6 + $0xf8] sm:$0xff]  }
 0x14a   : > { %3347 = vmatpush3.bf16.msra.mxu0 %v1391_v43  ;;  %3338 = vmatprep.mubr.msk.bf16.mxu0 %vm3828_vm1, %v3827_v16 }
 0x14b   : > { %3360 = vmatprep.subr.bf16.mxu0 %v3716_v50 }
 0x151   : > { %3339 = vmatmul.mubr.msk.bf16.gmra.mrb[4].mxu0 %vm736_vm6, %v2971_v6 }
 0x152   : > { %3342 = vmatprep.mubr.msk.bf16.mxu0 %vm3828_vm1, %v3827_v16 }
 0x159   : > { %3343 = vmatmul.mubr.msk.bf16.gmra.mrb[8].mxu0 %vm736_vm6, %v2972_v22 }
 0x15a   : > { %3348 = vmatprep.mubr.msk.bf16.mxu0 %vm3828_vm1, %v3827_v16 }
 0x161   : > { %3349 = vmatmul.mubr.msk.bf16.vlgmr.msra.gmra.mrb[0].mxu0 %vm736_vm6, %v4111_v61  ;;  %v4350_v61 = vld [vmem:[%s4666_s6 + $0x180] sm:$0xff]  }
 0x162   : > { %3352 = vmatprep.mubr.msk.bf16.mxu0 %vm3828_vm1, %v3827_v16  ;;  %3361 = vmatpush3.bf16.msra.mxu0 %v3716_v50 }
 0x163   : > { %3400 = vmatprep.subr.bf16.mxu1 %v4350_v61 }
 0x169   : > { %3353 = vmatmul.mubr.msk.bf16.gmra.mrb[4].mxu0 %vm736_vm6, %v4130_v9 }
 0x16a   : > { %3356 = vmatprep.mubr.msk.bf16.mxu0 %vm3828_vm1, %v3827_v16  ;;  %v3718_v16 = vld [vmem:[%s4666_s6 + $0xc8] sm:$0xff]  }
 0x16b   : > { %3362 = vmatprep.subr.bf16.mxu0 %v3718_v16 }
 0x16c   : > { %3363 = vmatpush3.bf16.msra.mxu0 %v3718_v16 }
 0x16d   : > { %3364 = vmatprep.subr.bf16.mxu0 %v3720_v4 }
 0x170   : > { %3365 = vmatpush3.bf16.msra.mxu0 %v3720_v4 }
 0x171   : > { %3357 = vmatmul.mubr.msk.bf16.gmra.mrb[8].mxu0 %vm736_vm6, %v4150_v24  ;;  %3366 = vmatprep.subr.bf16.mxu0 %v3722_v23 }
 0x174   : > { %3367 = vmatpush3.bf16.msra.mxu0 %v3722_v23 }
 0x175   : > { %3368 = vmatprep.subr.bf16.mxu0 %v3724_v36 }
 0x178   : > { %3369 = vmatpush3.bf16.msra.mxu0 %v3724_v36 }
 0x179   : > { %3370 = vmatprep.subr.bf16.mxu0 %v3726_v53 }
 0x17c   : > { %3371 = vmatpush3.bf16.msra.mxu0 %v3726_v53 }
 0x17d   : > { %3372 = vmatprep.subr.bf16.mxu0 %v3728_v59 }
 0x180   : > { %3373 = vmatpush3.bf16.msra.mxu0 %v3728_v59 }
 0x181   : > { %3374 = vmatprep.subr.bf16.mxu0 %v3730_v62 }
 0x184   : > { %3375 = vmatpush3.bf16.msra.mxu0 %v3730_v62 }
 0x234   : > { %v1427_v0 = vpop.f32.mrb[0].mxu0 }
 0x235   : > { %v1463_v3 = vmul.f32 %v2980_v63, %v1427_v0  ;;  %v3350_v49 = vpop.f32.mrb[1].mxu0 }
 0x236   : > { %v1430_v6 = vpop.f32.mrb[2].mxu0 }
 0x237   : > { %v1476_v7 = vadd.f32 %v2981_v2, %v1463_v3  ;;  %v1464_v8 = vmul.f32 %v2980_v63, %v1430_v6  ;;  %v3351_v9 = vpop.f32.mrb[3].mxu0 }
 0x239   : > { %v1477_v10 = vadd.f32 %v2981_v2, %v1464_v8  ;;  %v1482_v11 = vmax.f32 %v1476_v7, 0.0 }
 0x23b   : > { %v1483_v14 = vmax.f32 %v1477_v10, 0.0  ;;  %v3091_v15 = vpack.c.bf16 %v1482_v11, %v1482_v11 }
 0x23c   : > { %v1435_v12 = vpop.f32.mrb[4].mxu0 }
 0x23d   : > { %v3092_v20 = vpack.c.bf16 %v1483_v14, %v1483_v14  ;;  %v1465_v21 = vmul.f32 %v2980_v63, %v1435_v12  ;;  %v4362_v22 = vmul.bf16 %v3091_v15, %v1514_v13  ;;  %v3354_v24 = vpop.f32.mrb[5].mxu0  ;;  %v1523_v15 = vpop.permute.xlu1 %1522 }
 0x23e   : > { %v1438_v25 = vpop.f32.mrb[6].mxu0 }
 0x23f   : > { %v4364_v27 = vmul.bf16 1065369472, %v3092_v20  ;;  %v1478_v31 = vadd.f32 %v2981_v2, %v1465_v21  ;;  %v2988_v32 = vcombine.low %v4362_v22, %v4362_v22  ;;  %v1466_v38 = vmul.f32 %v2980_v63, %v1438_v25  ;;  %v3355_v26 = vpop.f32.mrb[7].mxu0 }
 0x241   : > { %v1484_v44 = vmax.f32 %v1478_v31, 0.0  ;;  %v1694_v45 = vshrl.u32 %v2988_v32, 16  ;;  %v1697_v18 = vshll.u32 %v2988_v32, 16  ;;  %v3023_v52 = vcombine.low %v4362_v22, %v4364_v27  ;;  %v3743_v22 = vld [vmem:[%s4666_s6 + $0x68] sm:$0xff]  }
 0x242   : > { %v1479_v19 = vadd.f32 %v2981_v2, %v1466_v38  ;;  %v2989_v42 = vcombine.low %v4364_v27, %v4364_v27 }
 0x243   : > { %v3093_v46 = vpack.c.bf16 %v1484_v44, %v1484_v44  ;;  %v2377_v54 = vrot.slane %v1697_v18, 1  ;;  %v1696_v51 = vrot.slane %v1694_v45, 7 }
 0x244   : > { %v1485_v34 = vmax.f32 %v1479_v19, 0.0  ;;  %v1443_v41 = vpop.f32.mrb[8].mxu0  ;;  %v1701_v55 = vshrl.u32 %v2989_v42, 16  ;;  %v1704_v40 = vshll.u32 %v2989_v42, 16 }
 0x245   : > { %v4372_v56 = vmul.bf16 1065369472, %v3093_v46  ;;  %v2378_v60 = vor.u32 %v2377_v54, %v1694_v45  ;;  %v1467_v28 = vmul.f32 %v2980_v63, %v1443_v41  ;;  %v3358_v33 = vpop.f32.mrb[9].mxu0  ;;  %v1699_v30 = vor.u32 %v1697_v18, %v1696_v51 }
 0x246   : > { %v3094_v37 = vpack.c.bf16 %v1485_v34, %v1485_v34  ;;  %v1446_v39 = vpop.f32.mrb[10].mxu0  ;;  %v1703_v43 = vrot.slane %v1701_v55, 7  ;;  %v2379_v47 = vrot.slane %v1704_v40, 1 }
 0x247   : > { %v2990_v50 = vcombine.low %v4372_v56, %v4372_v56  ;;  %v1480_v58 = vadd.f32 %v2981_v2, %v1467_v28  ;;  %v1468_v16 = vmul.f32 %v2980_v63, %v1446_v39  ;;  %v3359_v1 = vpop.f32.mrb[11].mxu0  ;;  %v1741_v4 = vsel %vm4039_vm7, 0, %v1699_v30  ;;  %v3731_v28 = vld [vmem:[%s4666_s6 + $0x188] sm:$0xff]  }
 0x248   : > { %v4378_v17 = vmul.bf16 1065369472, %v3094_v37  ;;  %v1706_v23 = vor.u32 %v1704_v40, %v1703_v43  ;;  %v3033_v29 = vcombine.low %v4364_v27, %v4372_v56  ;;  %v2380_v36 = vor.u32 %v2379_v47, %v1701_v55  ;;  %v3732_v1 = vld [vmem:[%s4666_s6 + $0x190] sm:$0xff]   ;;  %v3751_v27 = vld [vmem:[%s4666_s6 + $0x128] sm:$0xff]  }
 0x249   : > { %v1486_v48 = vmax.f32 %v1480_v58, 0.0  ;;  %v1481_v53 = vadd.f32 %v2981_v2, %v1468_v16  ;;  %v1708_v57 = vshrl.u32 %v2990_v50, 16  ;;  %v1711_v59 = vshll.u32 %v2990_v50, 16 }
 0x24a   : > { %v2991_v62 = vcombine.low %v4378_v17, %v4378_v17  ;;  %v1742_v63 = vsel %vm4039_vm7, 0, %v1706_v23  ;;  %v4388_v0 = vcombine.low %v4372_v56, %v4378_v17  ;;  %v2395_v3 = vsel %vm4076_vm8, %v2378_v60, 0  ;;  %v3752_v56 = vld [vmem:[%s4666_s6 + $0x130] sm:$0xff]  }
 0x24b   : > { %v3095_v49 = vpack.c.bf16 %v1486_v48, %v1486_v48  ;;  %v1710_v6 = vrot.slane %v1708_v57, 7  ;;  %v3004_v7 = vcombine.low %v1741_v4, %v1742_v63  ;;  %v2381_v8 = vrot.slane %v1711_v59, 1 }
 0x24c   : > { %v1715_v2 = vshrl.u32 %v2991_v62, 16  ;;  %v1487_v9 = vmax.f32 %v1481_v53, 0.0  ;;  %v1718_v10 = vshll.u32 %v2991_v62, 16  ;;  %v4394_v11 = vsel %vm4076_vm8, %v2380_v36, 0 }
 0x24d   : > { %v4396_v13 = vmul.bf16 1065369472, %v3095_v49  ;;  %v1713_v14 = vor.u32 %v1711_v59, %v1710_v6  ;;  %3396 = vmatprep.mubr.bf16.mxu1 %v3004_v7  ;;  %v4399_v12 = vcombine.low %v2395_v3, %v4394_v11  ;;  %v2382_v20 = vor.u32 %v2381_v8, %v1708_v57  ;;  %v3733_v59 = vld [vmem:[%s4666_s6 + $0x198] sm:$0xff]   ;;  %v3734_v3 = vld [vmem:[%s4666_s6 + $0x1a0] sm:$0xff]   ;;  %v3739_v7 = vld [vmem:[%s4666_s6 + $0x48] sm:$0xff]  }
 0x24e   : > { %v3096_v21 = vpack.c.bf16 %v1487_v9, %v1487_v9  ;;  %v1717_v24 = vrot.slane %v1715_v2, 7  ;;  %v2383_v25 = vrot.slane %v1718_v10, 1  ;;  %v3737_v49 = vld [vmem:[%s4666_s6 + $0x1b8] sm:$0xff]   ;;  %v3738_v6 = vld [vmem:[%s4666_s6 + $0x40] sm:$0xff]   ;;  %v3740_v8 = vld [vmem:[%s4666_s6 + $0x50] sm:$0xff]  }
 0x24f   : > { %v2992_v31 = vcombine.low %v4396_v13, %v4396_v13  ;;  %v1743_v32 = vsel %vm4039_vm7, 0, %v1713_v14  ;;  %v3034_v38 = vcombine.low %v4378_v17, %v4396_v13  ;;  %v4409_v26 = vsel %vm4076_vm8, %v2382_v20, 0  ;;  %v3742_v9 = vld [vmem:[%s4666_s6 + $0x60] sm:$0xff]   ;;  %v3748_v20 = vld [vmem:[%s4666_s6 + $0x110] sm:$0xff]  }
 0x250   : > { %v2994_v44 = vcombine.low %v1742_v63, %v1743_v32  ;;  %v4411_v45 = vmul.bf16 %v3096_v21, %v1523_v15  ;;  %v1720_v18 = vor.u32 %v1718_v10, %v1717_v24  ;;  %v2384_v19 = vor.u32 %v2383_v25, %v1715_v2  ;;  %v3741_v2 = vld [vmem:[%s4666_s6 + $0x58] sm:$0xff]   ;;  %v3746_v14 = vld [vmem:[%s4666_s6 + $0x100] sm:$0xff]   ;;  %v3747_v15 = vld [vmem:[%s4666_s6 + $0x108] sm:$0xff]  }
 0x251   : > { %v1722_v42 = vshrl.u32 %v2992_v31, 16  ;;  %v1725_v46 = vshll.u32 %v2992_v31, 16  ;;  %v3062_v54 = vcombine.low %v4394_v11, %v4409_v26  ;;  %v3745_v10 = vld [vmem:[%s4666_s6 + $0x78] sm:$0xff]   ;;  %v3750_v24 = vld [vmem:[%s4666_s6 + $0x120] sm:$0xff]   ;;  %v3755_v31 = vld [vmem:[%s4666_s6 + $0x1c8] sm:$0xff]  }
 0x252   : > { %v2993_v51 = vcombine.low %v4411_v45, %v4411_v45  ;;  %v3043_v34 = vcombine.low %v4396_v13, %v4411_v45  ;;  %3376 = vmatprep.mubr.bf16.mxu0 %v2994_v44  ;;  %v1744_v41 = vsel %vm4039_vm7, 0, %v1720_v18  ;;  %v4423_v55 = vsel %vm4076_vm8, %v2384_v19, 0  ;;  %v3749_v21 = vld [vmem:[%s4666_s6 + $0x118] sm:$0xff]   ;;  %v3754_v25 = vld [vmem:[%s4666_s6 + $0x1c0] sm:$0xff]   ;;  %v3768_v45 = vld [vmem:[%s4666_s6 + $0xb0] sm:$0xff]  }
 0x253   : > { %v1724_v40 = vrot.slane %v1722_v42, 7  ;;  %v3005_v60 = vcombine.low %v1743_v32, %v1744_v41  ;;  %v4430_v33 = vcombine.low %v4409_v26, %v4423_v55  ;;  %v2385_v30 = vrot.slane %v1725_v46, 1  ;;  %v3756_v32 = vld [vmem:[%s4666_s6 + $0x1d0] sm:$0xff]   ;;  %v3757_v44 = vld [vmem:[%s4666_s6 + $0x1d8] sm:$0xff]   ;;  %v3758_v17 = vld [vmem:[%s4666_s6 + $0x1e0] sm:$0xff]  }
 0x254   : > { %v1729_v37 = vshrl.u32 %v2993_v51, 16  ;;  %v1732_v39 = vshll.u32 %v2993_v51, 16  ;;  %v3761_v18 = vld [vmem:[%s4666_s6 + $0x1f8] sm:$0xff]   ;;  %v3762_v19 = vld [vmem:[%s4666_s6 + $0x80] sm:$0xff]   ;;  %v3775_v11 = vld [vmem:[%s4666_s6 + $0x168] sm:$0xff]  }
 0x255   : > { %v1727_v43 = vor.u32 %v1725_v46, %v1724_v40  ;;  %3397 = vmatmul.mubr.bf16.vlgmr.msra.gmra.mrb[0].mxu1 %v3005_v60  ;;  %v2386_v47 = vor.u32 %v2385_v30, %v1722_v42  ;;  %v3763_v42 = vld [vmem:[%s4666_s6 + $0x88] sm:$0xff]   ;;  %v3764_v46 = vld [vmem:[%s4666_s6 + $0x90] sm:$0xff]   ;;  %v3765_v51 = vld [vmem:[%s4666_s6 + $0x98] sm:$0xff]  }
 0x256   : > { %v1731_v50 = vrot.slane %v1729_v37, 7  ;;  %v2387_v58 = vrot.slane %v1732_v39, 1  ;;  %3401 = vmatpush3.bf16.msra.mxu1 %v4350_v61  ;;  %3416 = vmatprep.mubr.bf16.mxu1 %v3005_v60  ;;  %v3766_v13 = vld [vmem:[%s4666_s6 + $0xa0] sm:$0xff]   ;;  %v3771_v40 = vld [vmem:[%s4666_s6 + $0x148] sm:$0xff]   ;;  %v3772_v60 = vld [vmem:[%s4666_s6 + $0x150] sm:$0xff]  }
 0x257   : > { %v1745_v16 = vsel %vm4039_vm7, 0, %v1727_v43  ;;  %3402 = vmatprep.subr.bf16.mxu1 %v3731_v28  ;;  %v4440_v4 = vsel %vm4076_vm8, %v2386_v47, 0  ;;  %v3774_v30 = vld [vmem:[%s4666_s6 + $0x160] sm:$0xff]   ;;  %v3776_v26 = vld [vmem:[%s4666_s6 + $0x170] sm:$0xff]   ;;  %v3781_v47 = vld [vmem:[%s4666_s6 + $0x218] sm:$0xff]  }
 0x258   : > { %v1734_v23 = vor.u32 %v1732_v39, %v1731_v50  ;;  %v2388_v36 = vor.u32 %v2387_v58, %v1729_v37  ;;  %v2995_v48 = vcombine.low %v1744_v41, %v1745_v16  ;;  %v3063_v53 = vcombine.low %v4423_v55, %v4440_v4  ;;  %v3770_v41 = vld [vmem:[%s4666_s6 + $0x140] sm:$0xff]   ;;  %v3779_v39 = vld [vmem:[%s4666_s6 + $0x208] sm:$0xff]   ;;  %v3780_v43 = vld [vmem:[%s4666_s6 + $0x210] sm:$0xff]  }
 0x259   : > { %v3778_v37 = vld [vmem:[%s4666_s6 + $0x200] sm:$0xff]   ;;  %v3784_v50 = vld [vmem:[%s4666_s6 + $0x230] sm:$0xff]   ;;  %v3785_v58 = vld [vmem:[%s4666_s6 + $0x238] sm:$0xff]  }
 0x25a   : > { %3403 = vmatpush3.bf16.msra.mxu1 %v3731_v28  ;;  %3377 = vmatmul.mubr.bf16.vlgmr.msra.gmra.mrb[12].mxu0 %v2995_v48  ;;  %v1746_v61 = vsel %vm4039_vm7, 0, %v1734_v23  ;;  %v2400_v57 = vsel %vm4076_vm8, %v2388_v36, 0  ;;  %v3773_v28 = vld [vmem:[%s4666_s6 + $0x158] sm:$0xff]   ;;  %v3782_v55 = vld [vmem:[%s4666_s6 + $0x220] sm:$0xff]  }
 0x25b   : > { %3404 = vmatprep.subr.bf16.mxu1 %v3732_v1  ;;  %v3014_v62 = vcombine.low %v1745_v16, %v1746_v61  ;;  %v4452_v63 = vcombine.low %v4440_v4, %v2400_v57  ;;  %v3081_v48 = vld [vmem:[%s4667_s7] ss:$0 sm:$0xff] }
 0x25c   : > { %v3082_v57 = vld [vmem:[%s4668_s8] ss:$0 sm:$0xff] }
 0x25e   : > { %3405 = vmatpush3.bf16.msra.mxu1 %v3732_v1 }
 0x25f   : > { %3406 = vmatprep.subr.bf16.mxu1 %v3733_v59 }
 0x262   : > { %3407 = vmatpush3.bf16.msra.mxu1 %v3733_v59 }
 0x263   : > { %3408 = vmatprep.subr.bf16.mxu1 %v3734_v3 }
 0x266   : > { %3409 = vmatpush3.bf16.msra.mxu1 %v3734_v3 }
 0x267   : > { %3410 = vmatprep.subr.bf16.mxu1 %v3735_v5 }
 0x26a   : > { %3411 = vmatpush3.bf16.msra.mxu1 %v3735_v5 }
 0x26b   : > { %3412 = vmatprep.subr.bf16.mxu1 %v3736_v35 }
 0x26e   : > { %3413 = vmatpush3.bf16.msra.mxu1 %v3736_v35 }
 0x26f   : > { %3414 = vmatprep.subr.bf16.mxu1 %v3737_v49 }
 0x272   : > { %3415 = vmatpush3.bf16.msra.mxu1 %v3737_v49 }
 0x273   : > { %3420 = vmatprep.subr.bf16.mxu1 %v3738_v6 }
 0x275   : > { %3417 = vmatmul.mubr.bf16.vlgmr.msra.gmra.mrb[0].mxu1 %v3014_v62 }
 0x276   : > { %3421 = vmatpush3.bf16.msra.mxu1 %v3738_v6  ;;  %3436 = vmatprep.mubr.bf16.mxu1 %v3023_v52  ;;  %v3744_v52 = vld [vmem:[%s4666_s6 + $0x70] sm:$0xff]  }
 0x277   : > { %3422 = vmatprep.subr.bf16.mxu1 %v3739_v7 }
 0x27a   : > { %3423 = vmatpush3.bf16.msra.mxu1 %v3739_v7 }
 0x27b   : > { %3424 = vmatprep.subr.bf16.mxu1 %v3740_v8 }
 0x27e   : > { %3425 = vmatpush3.bf16.msra.mxu1 %v3740_v8 }
 0x27f   : > { %3426 = vmatprep.subr.bf16.mxu1 %v3741_v2 }
 0x282   : > { %3427 = vmatpush3.bf16.msra.mxu1 %v3741_v2 }
 0x283   : > { %3428 = vmatprep.subr.bf16.mxu1 %v3742_v9 }
 0x286   : > { %3429 = vmatpush3.bf16.msra.mxu1 %v3742_v9 }
 0x287   : > { %3430 = vmatprep.subr.bf16.mxu1 %v3743_v22 }
 0x28a   : > { %3431 = vmatpush3.bf16.msra.mxu1 %v3743_v22 }
 0x28b   : > { %3432 = vmatprep.subr.bf16.mxu1 %v3744_v52 }
 0x28e   : > { %3433 = vmatpush3.bf16.msra.mxu1 %v3744_v52 }
 0x28f   : > { %3434 = vmatprep.subr.bf16.mxu1 %v3745_v10 }
 0x292   : > { %3435 = vmatpush3.bf16.msra.mxu1 %v3745_v10 }
 0x293   : > { %3440 = vmatprep.subr.bf16.mxu1 %v3746_v14 }
 0x295   : > { %3437 = vmatmul.mubr.bf16.vlgmr.msra.gmra.mrb[0].mxu1 %v4388_v0 }
 0x296   : > { %3441 = vmatpush3.bf16.msra.mxu1 %v3746_v14  ;;  %3456 = vmatprep.mubr.bf16.mxu1 %v3033_v29  ;;  %v3753_v29 = vld [vmem:[%s4666_s6 + $0x138] sm:$0xff]  }
 0x297   : > { %3442 = vmatprep.subr.bf16.mxu1 %v3747_v15 }
 0x29a   : > { %3443 = vmatpush3.bf16.msra.mxu1 %v3747_v15 }
 0x29b   : > { %3444 = vmatprep.subr.bf16.mxu1 %v3748_v20 }
 0x29e   : > { %3445 = vmatpush3.bf16.msra.mxu1 %v3748_v20 }
 0x29f   : > { %3446 = vmatprep.subr.bf16.mxu1 %v3749_v21 }
 0x2a2   : > { %3447 = vmatpush3.bf16.msra.mxu1 %v3749_v21 }
 0x2a3   : > { %3448 = vmatprep.subr.bf16.mxu1 %v3750_v24 }
 0x2a6   : > { %3449 = vmatpush3.bf16.msra.mxu1 %v3750_v24 }
 0x2a7   : > { %3450 = vmatprep.subr.bf16.mxu1 %v3751_v27 }
 0x2aa   : > { %3451 = vmatpush3.bf16.msra.mxu1 %v3751_v27 }
 0x2ab   : > { %3452 = vmatprep.subr.bf16.mxu1 %v3752_v56 }
 0x2ae   : > { %3453 = vmatpush3.bf16.msra.mxu1 %v3752_v56 }
 0x2af   : > { %3454 = vmatprep.subr.bf16.mxu1 %v3753_v29 }
 0x2b2   : > { %3455 = vmatpush3.bf16.msra.mxu1 %v3753_v29 }
 0x2b3   : > { %3460 = vmatprep.subr.bf16.mxu1 %v3754_v25 }
 0x2b5   : > { %3457 = vmatmul.mubr.bf16.vlgmr.msra.gmra.mrb[0].mxu1 %v3034_v38  ;;  %v3760_v38 = vld [vmem:[%s4666_s6 + $0x1f0] sm:$0xff]  }
 0x2b6   : > { %3461 = vmatpush3.bf16.msra.mxu1 %v3754_v25  ;;  %3476 = vmatprep.mubr.bf16.mxu1 %v4388_v0  ;;  %v3759_v0 = vld [vmem:[%s4666_s6 + $0x1e8] sm:$0xff]  }
 0x2b7   : > { %3462 = vmatprep.subr.bf16.mxu1 %v3755_v31 }
 0x2ba   : > { %3463 = vmatpush3.bf16.msra.mxu1 %v3755_v31 }
 0x2bb   : > { %3464 = vmatprep.subr.bf16.mxu1 %v3756_v32 }
 0x2be   : > { %3465 = vmatpush3.bf16.msra.mxu1 %v3756_v32 }
 0x2bf   : > { %3466 = vmatprep.subr.bf16.mxu1 %v3757_v44 }
 0x2c2   : > { %3467 = vmatpush3.bf16.msra.mxu1 %v3757_v44 }
 0x2c3   : > { %3468 = vmatprep.subr.bf16.mxu1 %v3758_v17 }
 0x2c6   : > { %3469 = vmatpush3.bf16.msra.mxu1 %v3758_v17 }
 0x2c7   : > { %3470 = vmatprep.subr.bf16.mxu1 %v3759_v0 }
 0x2ca   : > { %3471 = vmatpush3.bf16.msra.mxu1 %v3759_v0 }
 0x2cb   : > { %3472 = vmatprep.subr.bf16.mxu1 %v3760_v38 }
 0x2ce   : > { %3473 = vmatpush3.bf16.msra.mxu1 %v3760_v38 }
 0x2cf   : > { %3474 = vmatprep.subr.bf16.mxu1 %v3761_v18 }
 0x2d2   : > { %3475 = vmatpush3.bf16.msra.mxu1 %v3761_v18 }
 0x2d3   : > { %3480 = vmatprep.subr.bf16.mxu1 %v3762_v19 }
 0x2d5   : > { %3477 = vmatmul.mubr.bf16.vlgmr.msra.gmra.mrb[0].mxu1 %v3043_v34  ;;  %v3769_v34 = vld [vmem:[%s4666_s6 + $0xb8] sm:$0xff]  }
 0x2d6   : > { %3481 = vmatpush3.bf16.msra.mxu1 %v3762_v19  ;;  %3496 = vmatprep.mubr.bf16.mxu1 %v4399_v12  ;;  %v3767_v12 = vld [vmem:[%s4666_s6 + $0xa8] sm:$0xff]  }
 0x2d7   : > { %3482 = vmatprep.subr.bf16.mxu1 %v3763_v42 }
 0x2da   : > { %3483 = vmatpush3.bf16.msra.mxu1 %v3763_v42 }
 0x2db   : > { %3484 = vmatprep.subr.bf16.mxu1 %v3764_v46 }
 0x2de   : > { %3485 = vmatpush3.bf16.msra.mxu1 %v3764_v46 }
 0x2df   : > { %3486 = vmatprep.subr.bf16.mxu1 %v3765_v51 }
 0x2e2   : > { %3487 = vmatpush3.bf16.msra.mxu1 %v3765_v51 }
 0x2e3   : > { %3488 = vmatprep.subr.bf16.mxu1 %v3766_v13 }
 0x2e6   : > { %3489 = vmatpush3.bf16.msra.mxu1 %v3766_v13 }
 0x2e7   : > { %3490 = vmatprep.subr.bf16.mxu1 %v3767_v12 }
 0x2ea   : > { %3491 = vmatpush3.bf16.msra.mxu1 %v3767_v12 }
 0x2eb   : > { %3492 = vmatprep.subr.bf16.mxu1 %v3768_v45 }
 0x2ee   : > { %3493 = vmatpush3.bf16.msra.mxu1 %v3768_v45 }
 0x2ef   : > { %3494 = vmatprep.subr.bf16.mxu1 %v3769_v34 }
 0x2f2   : > { %3495 = vmatpush3.bf16.msra.mxu1 %v3769_v34 }
 0x2f3   : > { %3500 = vmatprep.subr.bf16.mxu1 %v3770_v41 }
 0x2f5   : > { %3497 = vmatmul.mubr.bf16.vlgmr.msra.gmra.mrb[0].mxu1 %v4430_v33 }
 0x2f6   : > { %3501 = vmatpush3.bf16.msra.mxu1 %v3770_v41  ;;  %3516 = vmatprep.mubr.bf16.mxu1 %v3062_v54  ;;  %v3777_v54 = vld [vmem:[%s4666_s6 + $0x178] sm:$0xff]  }
 0x2f7   : > { %3502 = vmatprep.subr.bf16.mxu1 %v3771_v40 }
 0x2fa   : > { %3503 = vmatpush3.bf16.msra.mxu1 %v3771_v40 }
 0x2fb   : > { %3504 = vmatprep.subr.bf16.mxu1 %v3772_v60 }
 0x2fe   : > { %3505 = vmatpush3.bf16.msra.mxu1 %v3772_v60 }
 0x2ff   : > { %3506 = vmatprep.subr.bf16.mxu1 %v3773_v28 }
 0x302   : > { %3507 = vmatpush3.bf16.msra.mxu1 %v3773_v28 }
 0x303   : > { %3508 = vmatprep.subr.bf16.mxu1 %v3774_v30 }
 0x306   : > { %3509 = vmatpush3.bf16.msra.mxu1 %v3774_v30 }
 0x307   : > { %3510 = vmatprep.subr.bf16.mxu1 %v3775_v11 }
 0x30a   : > { %3511 = vmatpush3.bf16.msra.mxu1 %v3775_v11 }
 0x30b   : > { %3512 = vmatprep.subr.bf16.mxu1 %v3776_v26 }
 0x30e   : > { %3513 = vmatpush3.bf16.msra.mxu1 %v3776_v26 }
 0x30f   : > { %3514 = vmatprep.subr.bf16.mxu1 %v3777_v54 }
 0x312   : > { %3515 = vmatpush3.bf16.msra.mxu1 %v3777_v54 }
 0x313   : > { %3520 = vmatprep.subr.bf16.mxu1 %v3778_v37 }
 0x315   : > { %3517 = vmatmul.mubr.bf16.vlgmr.msra.gmra.mrb[0].mxu1 %v3063_v53 }
 0x316   : > { %3521 = vmatpush3.bf16.msra.mxu1 %v3778_v37  ;;  %3536 = vmatprep.mubr.bf16.mxu1 %v4430_v33  ;;  %v3783_v33 = vld [vmem:[%s4666_s6 + $0x228] sm:$0xff]  }
 0x317   : > { %3522 = vmatprep.subr.bf16.mxu1 %v3779_v39 }
 0x31a   : > { %3523 = vmatpush3.bf16.msra.mxu1 %v3779_v39 }
 0x31b   : > { %3524 = vmatprep.subr.bf16.mxu1 %v3780_v43 }
 0x31e   : > { %3525 = vmatpush3.bf16.msra.mxu1 %v3780_v43 }
 0x31f   : > { %3526 = vmatprep.subr.bf16.mxu1 %v3781_v47 }
 0x322   : > { %3527 = vmatpush3.bf16.msra.mxu1 %v3781_v47 }
 0x323   : > { %3528 = vmatprep.subr.bf16.mxu1 %v3782_v55 }
 0x326   : > { %3529 = vmatpush3.bf16.msra.mxu1 %v3782_v55 }
 0x327   : > { %3530 = vmatprep.subr.bf16.mxu1 %v3783_v33 }
 0x32a   : > { %3531 = vmatpush3.bf16.msra.mxu1 %v3783_v33 }
 0x32b   : > { %3532 = vmatprep.subr.bf16.mxu1 %v3784_v50 }
 0x32d   : > { %v3378_v16 = vpop.f32.mrb[12].mxu0 }
 0x32e   : > { %3533 = vmatpush3.bf16.msra.mxu1 %v3784_v50  ;;  %v1841_v1 = vpop.f32.mrb[13].mxu0 }
 0x32f   : > { %v3379_v4 = vpop.f32.mrb[14].mxu0  ;;  %3534 = vmatprep.subr.bf16.mxu1 %v3785_v58 }
 0x330   : > { %v1844_v23 = vpop.f32.mrb[15].mxu0 }
 0x332   : > { %3535 = vmatpush3.bf16.msra.mxu1 %v3785_v58 }
 0x335   : > { %3537 = vmatmul.mubr.bf16.vlgmr.msra.gmra.mrb[0].mxu1 %v4452_v63 }
 0x408   : > { %v3538_v36 = vpop.f32.mrb[0].mxu1 }
 0x409   : > { %v3540_v53 = vadd.f32 %v3538_v36, %v3378_v16  ;;  %v2707_v61 = vpop.f32.mrb[1].mxu1 }
 0x40a   : > { %v3541_v59 = vadd.f32 %v2707_v61, %v1841_v1  ;;  %v3539_v62 = vpop.f32.mrb[2].mxu1 }
 0x40b   : > { %v2735_v3 = vmul.f32 %v3540_v53, %v3081_v48  ;;  %v3542_v5 = vadd.f32 %v3539_v62, %v3379_v4  ;;  %v2710_v35 = vpop.f32.mrb[3].mxu1 }
 0x40c   : > { %v2733_v49 = vmul.f32 %v3541_v59, %v3081_v48  ;;  %v3543_v63 = vadd.f32 %v2710_v35, %v1844_v23 }
 0x40d   : > { %v2746_v6 = vadd.f32 %v3082_v57, %v2735_v3  ;;  %v2736_v7 = vmul.f32 %v3542_v5, %v3081_v48 }
 0x40e   : > { %v2744_v8 = vadd.f32 %v3082_v57, %v2733_v49  ;;  %v2734_v2 = vmul.f32 %v3543_v63, %v3081_v48 }
 0x40f   : > { %v2747_v9 = vadd.f32 %v3082_v57, %v2736_v7  ;;  %v2750_v52 = vmax.f32 %v2746_v6, 0.0 }
 0x410   : > { %v2745_v22 = vadd.f32 %v3082_v57, %v2734_v2  ;;  %v2748_v14 = vmax.f32 %v2744_v8, 0.0 }
 0x411   : > { %v2751_v10 = vmax.f32 %v2747_v9, 0.0 }
 0x412   : > { %v2749_v15 = vmax.f32 %v2745_v22, 0.0 }
 0x413   : > { %v3105_v20 = vpack.c.bf16 %v2751_v10, %v2750_v52 }
 0x414   : > { %v3100_v21 = vpack.c.bf16 %v2749_v15, %v2748_v14 }
 0x415   : > { %3107 = vst [vmem:[%s507_s25 + $0x8] sm:$0xff] %v3105_v20  }
 0x416   : > { %3101 = vst [vmem:[%s507_s25] sm:$0xff] %v3100_v21  }
 0x417 PF: > { %s19_s13 = sadd.s32 1, %s3824_s13   ;;  %s4680_s19 = sld [smem:[#allocation2_spill]] }
 0x418   : > { %p16_p1 = scmp.ge.s32.totalorder %s19_s13, 6   ;;  %s4681_s26 = sld [smem:[#allocation3_spill]] }
 0x419   : > { %s4682_s30 = smov %s3816_s11  ;;  %s4683_s10 = smov %s3820_s12 }
 0x41a   :  { %18 = sbr.rel (!%p16_p1) target bundleno = 4 (0x4), region = 92 }
 0x41d   : > { %s4684_s11 = smov %s4680_s19 }
 0x41e   : > { %s4685_s12 = smov %s4681_s26 }

</bundles_post_ra>
